<compile_context>
chip_gen: v6e
topology: v6e:2x2x1
jax: 0.10.0
libtpu: 0.0.40
codegen_flags: <defaults>
</compile_context>

<pallas_src>
import jax
import jax.numpy as jnp
from jax import lax
from jax.experimental import pallas as pl
from jax.experimental.pallas import tpu as pltpu

NEG_SLOPE = 0.2   # LeakyReLU slope
BN_EPS = 1e-5     # PyTorch BatchNorm2d default eps


def _make_dense_block_kernel(n_layers, c0, growth, h, w, margin):
    """Builds the fused DenseBlock kernel for one image (one grid step)."""
    hw = h * w
    taps = [(dy, dx) for dy in (-1, 0, 1) for dx in (-1, 0, 1)]  # t = ky*3 + kx

    def kernel(*refs):
        x_ref = refs[0]                                   # (C0, HW) f32
        param_refs = refs[1:1 + 4 * n_layers]             # per layer: scale, shift, w2d, bias
        out_ref = refs[1 + 4 * n_layers]                  # (C_total, HW) f32
        act_ref = refs[2 + 4 * n_layers]                  # (Cin_max, HW + 2*margin) f32 scratch
        patch_ref = refs[3 + 4 * n_layers]                # (9*Cin_max, HW) f32 scratch

        # Zero the activation scratch once per image; its left/right margins act
        # as the conv's zero padding (the interior is rewritten every layer).
        act_ref[...] = jnp.zeros_like(act_ref)

        # Row-boundary masks over the flattened H*W lane axis: a +-1 shift along
        # x must not leak the neighbouring image row.  Vertical (+-W) shifts
        # that fall off the image land in the zero margins, so no mask needed.
        col = lax.broadcasted_iota(jnp.int32, (1, hw), 1) % w
        mask_left = (col >= 1).astype(jnp.float32)        # tap dx == -1
        mask_right = (col <= w - 2).astype(jnp.float32)   # tap dx == +1

        # Seed the VMEM-resident dense feature map with the input channels; each
        # layer appends growth channels below.  The whole concatenation is
        # written back to HBM exactly once (lane-dense: HW lanes per row).
        out_ref[0:c0, :] = x_ref[...]

        for layer in range(n_layers):
            scale_ref, shift_ref, w_ref, b_ref = param_refs[4 * layer:4 * layer + 4]
            cin = c0 + layer * growth

            # BatchNorm (folded running stats) + LeakyReLU(0.2), all in f32 (VPU).
            feat = out_ref[0:cin, :]                              # (cin, HW)
            act = feat * scale_ref[...] + shift_ref[...]          # (cin,1) broadcast
            act = jnp.where(act >= 0.0, act, NEG_SLOPE * act)
            act_ref[0:cin, margin:margin + hw] = act              # aligned interior store

            # im2col patch in (9*Cin, HW) orientation: each tap is a full-width
            # window read at a static lane offset from the zero-margined scratch.
            for t, (dy, dx) in enumerate(taps):
                off = margin + dy * w + dx
                win = act_ref[0:cin, off:off + hw]                # (cin, HW)
                if dx == 1:
                    win = win * mask_right
                elif dx == -1:
                    win = win * mask_left
                patch_ref[t * cin:(t + 1) * cin, :] = win

            # One MXU matmul per layer: (Cout, 9*Cin) x (9*Cin, HW).
            # bf16 operands, f32 accumulation; output rows are lane-dense.
            patch = patch_ref[0:9 * cin, :].astype(jnp.bfloat16)
            conv = jnp.dot(w_ref[...], patch, preferred_element_type=jnp.float32)
            out_ref[cin:cin + growth, :] = conv + b_ref[...]      # Dropout2d == identity (eval)

    return kernel


def dense_block_forward(x_nchw, layer_params):
    """Fused DenseBlock forward. Returns the full dense concat (N, C0+L*g, H, W)."""
    N, C0, H, W = x_nchw.shape
    HW = H * W
    L = len(layer_params)
    g = layer_params[0]["conv_w"].shape[0]
    C_total = C0 + L * g
    cin_max = C0 + (L - 1) * g
    margin = 128  # >= W+1; 128 keeps the interior activation store lane-aligned

    x_flat = x_nchw.astype(jnp.float32).reshape(N, C0, HW)  # channels-major, free reshape

    inputs = [x_flat]
    in_specs = [pl.BlockSpec((None, C0, HW), lambda n: (n, 0, 0))]
    for i, p in enumerate(layer_params):
        cin = C0 + i * g
        # Fold eval-mode BatchNorm into a per-channel affine.
        scale = (p["bn_gamma"] / jnp.sqrt(p["bn_var"] + BN_EPS)).astype(jnp.float32)
        shift = (p["bn_beta"] - p["bn_mean"] * scale).astype(jnp.float32)
        # Conv weight pre-shaped host-side to the exact matmul operand:
        # (Cout, Cin, 3, 3) -> (Cout, 9*Cin), column index = (ky*3+kx)*Cin + c.
        w2d = (jnp.transpose(p["conv_w"], (0, 2, 3, 1))
               .reshape(g, 9 * cin).astype(jnp.bfloat16))
        bias = p["conv_b"].reshape(g, 1).astype(jnp.float32)
        inputs += [scale.reshape(cin, 1), shift.reshape(cin, 1), w2d, bias]
        in_specs += [
            pl.BlockSpec((cin, 1), lambda n: (0, 0)),
            pl.BlockSpec((cin, 1), lambda n: (0, 0)),
            pl.BlockSpec((g, 9 * cin), lambda n: (0, 0)),
            pl.BlockSpec((g, 1), lambda n: (0, 0)),
        ]

    kernel = _make_dense_block_kernel(L, C0, g, H, W, margin)

    # NOTE: one grid step == one image; at 16x16 the whole image fits trivially
    # in VMEM.  At real resolutions, tile H into row blocks with a 1-row halo
    # and raise vmem_limit_bytes (v7x has only 64 MiB VMEM).
    out = pl.pallas_call(
        kernel,
        out_shape=jax.ShapeDtypeStruct((N, C_total, HW), jnp.float32),
        grid=(N,),
        in_specs=in_specs,
        out_specs=pl.BlockSpec((None, C_total, HW), lambda n: (n, 0, 0)),
        scratch_shapes=[
            pltpu.VMEM((cin_max, HW + 2 * margin), jnp.float32),  # zero-margined activation
            pltpu.VMEM((9 * cin_max, HW), jnp.float32),           # im2col patch
        ],
        compiler_params=pltpu.CompilerParams(dimension_semantics=("parallel",)),
    )(*inputs)
    return out.reshape(N, C_total, H, W)


class DenseBlockPallas:
    """Pallas port of DenseBlock(in_channels, growth_rate, n_layers, upsample)."""

    def __init__(self, in_channels, growth_rate, n_layers, upsample=False, key=None):
        self.in_channels = in_channels
        self.growth_rate = growth_rate
        self.n_layers = n_layers
        self.upsample = upsample
        key = jax.random.PRNGKey(0) if key is None else key
        self.layer_params = []
        for i in range(n_layers):
            cin = in_channels + i * growth_rate
            key, k1, k2, k3, k4, k5, k6 = jax.random.split(key, 7)
            fan_in = cin * 9
            self.layer_params.append(dict(
                bn_gamma=jax.random.uniform(k1, (cin,), jnp.float32, 0.5, 1.5),
                bn_beta=0.1 * jax.random.normal(k2, (cin,), jnp.float32),
                bn_mean=0.1 * jax.random.normal(k3, (cin,), jnp.float32),
                bn_var=jax.random.uniform(k4, (cin,), jnp.float32, 0.5, 1.5),
                conv_w=jax.random.normal(k5, (growth_rate, cin, 3, 3), jnp.float32)
                       / jnp.sqrt(float(fan_in)),
                conv_b=0.01 * jax.random.normal(k6, (growth_rate,), jnp.float32),
            ))

    def __call__(self, x_nchw):
        full = dense_block_forward(x_nchw, self.layer_params)
        if self.upsample:
            # torch.cat(new_features, 1) == channels [in_channels:] of the dense concat.
            return full[:, self.in_channels:, :, :]
        return full


def dense_block_reference(x_nchw, layer_params, upsample=False):
    """Pure-JAX reference with matching numerics (f32 BN/LeakyReLU, bf16 conv
    operands, f32 accumulation); eval-mode BN, identity Dropout2d."""
    x = x_nchw.astype(jnp.float32)
    new_features = []
    for p in layer_params:
        scale = p["bn_gamma"] / jnp.sqrt(p["bn_var"] + BN_EPS)
        shift = p["bn_beta"] - p["bn_mean"] * scale
        a = x * scale[None, :, None, None] + shift[None, :, None, None]
        a = jnp.where(a >= 0.0, a, NEG_SLOPE * a)
        out = lax.conv_general_dilated(
            a.astype(jnp.bfloat16),
            p["conv_w"].astype(jnp.bfloat16),
            window_strides=(1, 1),
            padding=((1, 1), (1, 1)),
            dimension_numbers=("NCHW", "OIHW", "NCHW"),
            preferred_element_type=jnp.float32,
        ) + p["conv_b"][None, :, None, None]
        new_features.append(out)
        x = jnp.concatenate([x, out], axis=1)
    return jnp.concatenate(new_features, axis=1) if upsample else x


if __name__ == "__main__":
    key = jax.random.PRNGKey(0)
    kx, kp = jax.random.split(key)

    N, C, H, W = 2, 4, 16, 16
    growth_rate, n_layers = 4, 3

    x = jax.random.normal(kx, (N, C, H, W), jnp.float32)

    # Standard (downsample-path) DenseBlock.
    block = DenseBlockPallas(C, growth_rate, n_layers, upsample=False, key=kp)
    y = block(x)
    jax.block_until_ready(y)
    assert y.shape == (N, C + n_layers * growth_rate, H, W), y.shape
    assert bool(jnp.all(jnp.isfinite(y)))
    y_ref = dense_block_reference(x, block.layer_params, upsample=False)
    err = float(jnp.max(jnp.abs(y - y_ref)))
    assert err < 5e-3, f"max abs error vs reference: {err}"

    # Upsample variant (returns only the newly grown features).
    block_up = DenseBlockPallas(C, growth_rate, n_layers, upsample=True, key=kp)
    y_up = block_up(x)
    jax.block_until_ready(y_up)
    assert y_up.shape == (N, n_layers * growth_rate, H, W), y_up.shape
    y_up_ref = dense_block_reference(x, block_up.layer_params, upsample=True)
    err_up = float(jnp.max(jnp.abs(y_up - y_up_ref)))
    assert err_up < 5e-3, f"max abs error vs reference (upsample): {err_up}"

    print("KERNEL_OK")
</pallas_src>

<mosaic_0001>
module attributes {stable_mosaic.version = 11 : i64} {
  func.func @kernel(%arg0: i32, %arg1: memref<1x4x256xf32, #tpu.memory_space<vmem>>, %arg2: memref<4x1xf32, #tpu.memory_space<vmem>>, %arg3: memref<4x1xf32, #tpu.memory_space<vmem>>, %arg4: memref<4x36xbf16, #tpu.memory_space<vmem>>, %arg5: memref<4x1xf32, #tpu.memory_space<vmem>>, %arg6: memref<8x1xf32, #tpu.memory_space<vmem>>, %arg7: memref<8x1xf32, #tpu.memory_space<vmem>>, %arg8: memref<4x72xbf16, #tpu.memory_space<vmem>>, %arg9: memref<4x1xf32, #tpu.memory_space<vmem>>, %arg10: memref<12x1xf32, #tpu.memory_space<vmem>>, %arg11: memref<12x1xf32, #tpu.memory_space<vmem>>, %arg12: memref<4x108xbf16, #tpu.memory_space<vmem>>, %arg13: memref<4x1xf32, #tpu.memory_space<vmem>>, %arg14: memref<1x16x256xf32, #tpu.memory_space<vmem>>, %arg15: memref<12x512xf32, #tpu.memory_space<vmem>>, %arg16: memref<108x256xf32, #tpu.memory_space<vmem>>) attributes {dimension_semantics = [#tpu.dimension_semantics<parallel>], iteration_bounds = array<i64: 2>, scalar_prefetch = 0 : i64, scratch_operands = 2 : i64, tpu.core_type = #tpu.core_type<tc>, window_params = [{transform_indices = @transform_0, window_bounds = array<i64: 1, 4, 256>}, {pipeline_mode = #tpu.pipeline_mode<synchronous>, transform_indices = @transform_1, window_bounds = array<i64: 4, 1>}, {pipeline_mode = #tpu.pipeline_mode<synchronous>, transform_indices = @transform_2, window_bounds = array<i64: 4, 1>}, {pipeline_mode = #tpu.pipeline_mode<synchronous>, transform_indices = @transform_3, window_bounds = array<i64: 4, 36>}, {pipeline_mode = #tpu.pipeline_mode<synchronous>, transform_indices = @transform_4, window_bounds = array<i64: 4, 1>}, {pipeline_mode = #tpu.pipeline_mode<synchronous>, transform_indices = @transform_5, window_bounds = array<i64: 8, 1>}, {pipeline_mode = #tpu.pipeline_mode<synchronous>, transform_indices = @transform_6, window_bounds = array<i64: 8, 1>}, {pipeline_mode = #tpu.pipeline_mode<synchronous>, transform_indices = @transform_7, window_bounds = array<i64: 4, 72>}, {pipeline_mode = #tpu.pipeline_mode<synchronous>, transform_indices = @transform_8, window_bounds = array<i64: 4, 1>}, {pipeline_mode = #tpu.pipeline_mode<synchronous>, transform_indices = @transform_9, window_bounds = array<i64: 12, 1>}, {pipeline_mode = #tpu.pipeline_mode<synchronous>, transform_indices = @transform_10, window_bounds = array<i64: 12, 1>}, {pipeline_mode = #tpu.pipeline_mode<synchronous>, transform_indices = @transform_11, window_bounds = array<i64: 4, 108>}, {pipeline_mode = #tpu.pipeline_mode<synchronous>, transform_indices = @transform_12, window_bounds = array<i64: 4, 1>}, {transform_indices = @transform_13, window_bounds = array<i64: 1, 16, 256>}]} {
    %cst = arith.constant 0.000000e+00 : f32
    %0 = vector.broadcast %cst : f32 to vector<12x512xf32>
    %c0 = arith.constant 0 : index
    %c0_0 = arith.constant 0 : index
    %1 = vector.load %arg15[%c0, %c0_0] : memref<12x512xf32, #tpu.memory_space<vmem>>, vector<12x512xf32>
    tpu.vector_store %arg15[%c0, %c0_0], %0 {strides = array<i32>} : memref<12x512xf32, #tpu.memory_space<vmem>>, vector<12x512xf32>,
    %2 = tpu.iota {dimensions = array<i32: 1>} : vector<1x256xi32>
    %c16_i32 = arith.constant 16 : i32
    %c0_i32 = arith.constant 0 : i32
    %3 = arith.cmpi eq, %c16_i32, %c0_i32 : i32
    %c1_i32 = arith.constant 1 : i32
    %4 = arith.select %3, %c1_i32, %c16_i32 : i32
    %5 = vector.broadcast %4 : i32 to vector<1x256xi32>
    %6 = arith.remsi %2, %5 : vector<1x256xi32>
    %c0_i32_1 = arith.constant 0 : i32
    %7 = vector.broadcast %c0_i32_1 : i32 to vector<1x256xi32>
    %8 = arith.cmpi ne, %6, %7 : vector<1x256xi32>
    %c0_i32_2 = arith.constant 0 : i32
    %9 = vector.broadcast %c0_i32_2 : i32 to vector<1x256xi32>
    %10 = arith.cmpi slt, %6, %9 : vector<1x256xi32>
    %c0_i32_3 = arith.constant 0 : i32
    %11 = arith.cmpi slt, %4, %c0_i32_3 : i32
    %12 = vector.broadcast %11 : i1 to vector<1x256xi1>
    %13 = vector.broadcast %12 : vector<1x256xi1> to vector<1x256xi1>
    %14 = arith.xori %10, %13 : vector<1x256xi1>
    %15 = arith.andi %14, %8 : vector<1x256xi1>
    %16 = vector.broadcast %4 : i32 to vector<1x256xi32>
    %17 = arith.addi %6, %16 : vector<1x256xi32>
    %18 = arith.select %15, %17, %6 : vector<1x256xi1>, vector<1x256xi32>
    %c1_i32_4 = arith.constant 1 : i32
    %19 = vector.broadcast %c1_i32_4 : i32 to vector<1x256xi32>
    %20 = arith.cmpi sge, %18, %19 : vector<1x256xi32>
    %21 = arith.extui %20 : vector<1x256xi1> to vector<1x256xi32>
    %22 = arith.sitofp %21 : vector<1x256xi32> to vector<1x256xf32>
    %c14_i32 = arith.constant 14 : i32
    %23 = vector.broadcast %c14_i32 : i32 to vector<1x256xi32>
    %24 = arith.cmpi sle, %18, %23 : vector<1x256xi32>
    %25 = arith.extui %24 : vector<1x256xi1> to vector<1x256xi32>
    %26 = arith.sitofp %25 : vector<1x256xi32> to vector<1x256xf32>
    %c0_5 = arith.constant 0 : index
    %c0_6 = arith.constant 0 : index
    %c0_7 = arith.constant 0 : index
    %27 = vector.load %arg1[%c0_5, %c0_6, %c0_7] : memref<1x4x256xf32, #tpu.memory_space<vmem>>, vector<1x4x256xf32>
    %28 = vector.shape_cast %27 : vector<1x4x256xf32> to vector<4x256xf32>
    %c0_8 = arith.constant 0 : index
    %c0_9 = arith.constant 0 : index
    %c0_10 = arith.constant 0 : index
    %29 = vector.load %arg14[%c0_8, %c0_9, %c0_10] : memref<1x16x256xf32, #tpu.memory_space<vmem>>, vector<1x4x256xf32>
    %30 = vector.shape_cast %29 : vector<1x4x256xf32> to vector<4x256xf32>
    %31 = vector.shape_cast %28 : vector<4x256xf32> to vector<1x4x256xf32>
    tpu.vector_store %arg14[%c0_8, %c0_9, %c0_10], %31 {strides = array<i32>} : memref<1x16x256xf32, #tpu.memory_space<vmem>>, vector<1x4x256xf32>,
    %c0_11 = arith.constant 0 : index
    %c0_12 = arith.constant 0 : index
    %c0_13 = arith.constant 0 : index
    %32 = vector.load %arg14[%c0_11, %c0_12, %c0_13] : memref<1x16x256xf32, #tpu.memory_space<vmem>>, vector<1x4x256xf32>
    %33 = vector.shape_cast %32 : vector<1x4x256xf32> to vector<4x256xf32>
    %c0_14 = arith.constant 0 : index
    %c0_15 = arith.constant 0 : index
    %34 = vector.load %arg2[%c0_14, %c0_15] : memref<4x1xf32, #tpu.memory_space<vmem>>, vector<4x1xf32>
    %35 = vector.broadcast %34 : vector<4x1xf32> to vector<4x256xf32>
    %36 = arith.mulf %33, %35 : vector<4x256xf32>
    %c0_16 = arith.constant 0 : index
    %c0_17 = arith.constant 0 : index
    %37 = vector.load %arg3[%c0_16, %c0_17] : memref<4x1xf32, #tpu.memory_space<vmem>>, vector<4x1xf32>
    %38 = vector.broadcast %37 : vector<4x1xf32> to vector<4x256xf32>
    %39 = arith.addf %36, %38 : vector<4x256xf32>
    %cst_18 = arith.constant 0.000000e+00 : f32
    %40 = vector.broadcast %cst_18 : f32 to vector<4x256xf32>
    %41 = arith.cmpf oge, %39, %40 : vector<4x256xf32>
    %cst_19 = arith.constant 2.000000e-01 : f32
    %42 = vector.broadcast %cst_19 : f32 to vector<4x256xf32>
    %43 = arith.mulf %42, %39 : vector<4x256xf32>
    %44 = arith.select %41, %39, %43 : vector<4x256xi1>, vector<4x256xf32>
    %c0_20 = arith.constant 0 : index
    %c128 = arith.constant 128 : index
    %45 = vector.load %arg15[%c0_20, %c128] : memref<12x512xf32, #tpu.memory_space<vmem>>, vector<4x256xf32>
    tpu.vector_store %arg15[%c0_20, %c128], %44 {strides = array<i32>} : memref<12x512xf32, #tpu.memory_space<vmem>>, vector<4x256xf32>,
    %c0_21 = arith.constant 0 : index
    %c111 = arith.constant 111 : index
    %46 = vector.load %arg15[%c0_21, %c111] : memref<12x512xf32, #tpu.memory_space<vmem>>, vector<4x256xf32>
    %47 = vector.broadcast %22 : vector<1x256xf32> to vector<4x256xf32>
    %48 = arith.mulf %46, %47 : vector<4x256xf32>
    %c0_22 = arith.constant 0 : index
    %c0_23 = arith.constant 0 : index
    %49 = vector.load %arg16[%c0_22, %c0_23] : memref<108x256xf32, #tpu.memory_space<vmem>>, vector<4x256xf32>
    tpu.vector_store %arg16[%c0_22, %c0_23], %48 {strides = array<i32>} : memref<108x256xf32, #tpu.memory_space<vmem>>, vector<4x256xf32>,
    %c0_24 = arith.constant 0 : index
    %c112 = arith.constant 112 : index
    %50 = vector.load %arg15[%c0_24, %c112] : memref<12x512xf32, #tpu.memory_space<vmem>>, vector<4x256xf32>
    %c4 = arith.constant 4 : index
    %c0_25 = arith.constant 0 : index
    %51 = vector.load %arg16[%c4, %c0_25] : memref<108x256xf32, #tpu.memory_space<vmem>>, vector<4x256xf32>
    tpu.vector_store %arg16[%c4, %c0_25], %50 {strides = array<i32>} : memref<108x256xf32, #tpu.memory_space<vmem>>, vector<4x256xf32>,
    %c0_26 = arith.constant 0 : index
    %c113 = arith.constant 113 : index
    %52 = vector.load %arg15[%c0_26, %c113] : memref<12x512xf32, #tpu.memory_space<vmem>>, vector<4x256xf32>
    %53 = vector.broadcast %26 : vector<1x256xf32> to vector<4x256xf32>
    %54 = arith.mulf %52, %53 : vector<4x256xf32>
    %c8 = arith.constant 8 : index
    %c0_27 = arith.constant 0 : index
    %55 = vector.load %arg16[%c8, %c0_27] : memref<108x256xf32, #tpu.memory_space<vmem>>, vector<4x256xf32>
    tpu.vector_store %arg16[%c8, %c0_27], %54 {strides = array<i32>} : memref<108x256xf32, #tpu.memory_space<vmem>>, vector<4x256xf32>,
    %c0_28 = arith.constant 0 : index
    %c127 = arith.constant 127 : index
    %56 = vector.load %arg15[%c0_28, %c127] : memref<12x512xf32, #tpu.memory_space<vmem>>, vector<4x256xf32>
    %57 = vector.broadcast %22 : vector<1x256xf32> to vector<4x256xf32>
    %58 = arith.mulf %56, %57 : vector<4x256xf32>
    %c12 = arith.constant 12 : index
    %c0_29 = arith.constant 0 : index
    %59 = vector.load %arg16[%c12, %c0_29] : memref<108x256xf32, #tpu.memory_space<vmem>>, vector<4x256xf32>
    tpu.vector_store %arg16[%c12, %c0_29], %58 {strides = array<i32>} : memref<108x256xf32, #tpu.memory_space<vmem>>, vector<4x256xf32>,
    %c0_30 = arith.constant 0 : index
    %c128_31 = arith.constant 128 : index
    %60 = vector.load %arg15[%c0_30, %c128_31] : memref<12x512xf32, #tpu.memory_space<vmem>>, vector<4x256xf32>
    %c16 = arith.constant 16 : index
    %c0_32 = arith.constant 0 : index
    %61 = vector.load %arg16[%c16, %c0_32] : memref<108x256xf32, #tpu.memory_space<vmem>>, vector<4x256xf32>
    tpu.vector_store %arg16[%c16, %c0_32], %60 {strides = array<i32>} : memref<108x256xf32, #tpu.memory_space<vmem>>, vector<4x256xf32>,
    %c0_33 = arith.constant 0 : index
    %c129 = arith.constant 129 : index
    %62 = vector.load %arg15[%c0_33, %c129] : memref<12x512xf32, #tpu.memory_space<vmem>>, vector<4x256xf32>
    %63 = vector.broadcast %26 : vector<1x256xf32> to vector<4x256xf32>
    %64 = arith.mulf %62, %63 : vector<4x256xf32>
    %c20 = arith.constant 20 : index
    %c0_34 = arith.constant 0 : index
    %65 = vector.load %arg16[%c20, %c0_34] : memref<108x256xf32, #tpu.memory_space<vmem>>, vector<4x256xf32>
    tpu.vector_store %arg16[%c20, %c0_34], %64 {strides = array<i32>} : memref<108x256xf32, #tpu.memory_space<vmem>>, vector<4x256xf32>,
    %c0_35 = arith.constant 0 : index
    %c143 = arith.constant 143 : index
    %66 = vector.load %arg15[%c0_35, %c143] : memref<12x512xf32, #tpu.memory_space<vmem>>, vector<4x256xf32>
    %67 = vector.broadcast %22 : vector<1x256xf32> to vector<4x256xf32>
    %68 = arith.mulf %66, %67 : vector<4x256xf32>
    %c24 = arith.constant 24 : index
    %c0_36 = arith.constant 0 : index
    %69 = vector.load %arg16[%c24, %c0_36] : memref<108x256xf32, #tpu.memory_space<vmem>>, vector<4x256xf32>
    tpu.vector_store %arg16[%c24, %c0_36], %68 {strides = array<i32>} : memref<108x256xf32, #tpu.memory_space<vmem>>, vector<4x256xf32>,
    %c0_37 = arith.constant 0 : index
    %c144 = arith.constant 144 : index
    %70 = vector.load %arg15[%c0_37, %c144] : memref<12x512xf32, #tpu.memory_space<vmem>>, vector<4x256xf32>
    %c28 = arith.constant 28 : index
    %c0_38 = arith.constant 0 : index
    %71 = vector.load %arg16[%c28, %c0_38] : memref<108x256xf32, #tpu.memory_space<vmem>>, vector<4x256xf32>
    tpu.vector_store %arg16[%c28, %c0_38], %70 {strides = array<i32>} : memref<108x256xf32, #tpu.memory_space<vmem>>, vector<4x256xf32>,
    %c0_39 = arith.constant 0 : index
    %c145 = arith.constant 145 : index
    %72 = vector.load %arg15[%c0_39, %c145] : memref<12x512xf32, #tpu.memory_space<vmem>>, vector<4x256xf32>
    %73 = vector.broadcast %26 : vector<1x256xf32> to vector<4x256xf32>
    %74 = arith.mulf %72, %73 : vector<4x256xf32>
    %c32 = arith.constant 32 : index
    %c0_40 = arith.constant 0 : index
    %75 = vector.load %arg16[%c32, %c0_40] : memref<108x256xf32, #tpu.memory_space<vmem>>, vector<4x256xf32>
    tpu.vector_store %arg16[%c32, %c0_40], %74 {strides = array<i32>} : memref<108x256xf32, #tpu.memory_space<vmem>>, vector<4x256xf32>,
    %c0_41 = arith.constant 0 : index
    %c0_42 = arith.constant 0 : index
    %76 = vector.load %arg16[%c0_41, %c0_42] : memref<108x256xf32, #tpu.memory_space<vmem>>, vector<36x256xf32>
    %77 = arith.truncf %76 : vector<36x256xf32> to vector<36x256xbf16>
    %c0_43 = arith.constant 0 : index
    %c0_44 = arith.constant 0 : index
    %78 = vector.load %arg4[%c0_43, %c0_44] : memref<4x36xbf16, #tpu.memory_space<vmem>>, vector<4x36xbf16>
    %cst_45 = arith.constant dense<0.000000e+00> : vector<4x256xf32>
    %79 = tpu.matmul %78, %77, %cst_45 {dimension_numbers = #tpu.dot_dimension_numbers<[1], [0], [0], [1], [0, 0, 1, 1], [], []>} : vector<4x36xbf16>, vector<36x256xbf16>, vector<4x256xf32> -> vector<4x256xf32>
    %c0_46 = arith.constant 0 : index
    %c0_47 = arith.constant 0 : index
    %80 = vector.load %arg5[%c0_46, %c0_47] : memref<4x1xf32, #tpu.memory_space<vmem>>, vector<4x1xf32>
    %81 = vector.broadcast %80 : vector<4x1xf32> to vector<4x256xf32>
    %82 = arith.addf %79, %81 : vector<4x256xf32>
    %c0_48 = arith.constant 0 : index
    %c4_49 = arith.constant 4 : index
    %c0_50 = arith.constant 0 : index
    %83 = vector.load %arg14[%c0_48, %c4_49, %c0_50] : memref<1x16x256xf32, #tpu.memory_space<vmem>>, vector<1x4x256xf32>
    %84 = vector.shape_cast %83 : vector<1x4x256xf32> to vector<4x256xf32>
    %85 = vector.shape_cast %82 : vector<4x256xf32> to vector<1x4x256xf32>
    tpu.vector_store %arg14[%c0_48, %c4_49, %c0_50], %85 {strides = array<i32>} : memref<1x16x256xf32, #tpu.memory_space<vmem>>, vector<1x4x256xf32>,
    %c0_51 = arith.constant 0 : index
    %c0_52 = arith.constant 0 : index
    %c0_53 = arith.constant 0 : index
    %86 = vector.load %arg14[%c0_51, %c0_52, %c0_53] : memref<1x16x256xf32, #tpu.memory_space<vmem>>, vector<1x8x256xf32>
    %87 = vector.shape_cast %86 : vector<1x8x256xf32> to vector<8x256xf32>
    %c0_54 = arith.constant 0 : index
    %c0_55 = arith.constant 0 : index
    %88 = vector.load %arg6[%c0_54, %c0_55] : memref<8x1xf32, #tpu.memory_space<vmem>>, vector<8x1xf32>
    %89 = vector.broadcast %88 : vector<8x1xf32> to vector<8x256xf32>
    %90 = arith.mulf %87, %89 : vector<8x256xf32>
    %c0_56 = arith.constant 0 : index
    %c0_57 = arith.constant 0 : index
    %91 = vector.load %arg7[%c0_56, %c0_57] : memref<8x1xf32, #tpu.memory_space<vmem>>, vector<8x1xf32>
    %92 = vector.broadcast %91 : vector<8x1xf32> to vector<8x256xf32>
    %93 = arith.addf %90, %92 : vector<8x256xf32>
    %cst_58 = arith.constant 0.000000e+00 : f32
    %94 = vector.broadcast %cst_58 : f32 to vector<8x256xf32>
    %95 = arith.cmpf oge, %93, %94 : vector<8x256xf32>
    %cst_59 = arith.constant 2.000000e-01 : f32
    %96 = vector.broadcast %cst_59 : f32 to vector<8x256xf32>
    %97 = arith.mulf %96, %93 : vector<8x256xf32>
    %98 = arith.select %95, %93, %97 : vector<8x256xi1>, vector<8x256xf32>
    %c0_60 = arith.constant 0 : index
    %c128_61 = arith.constant 128 : index
    %99 = vector.load %arg15[%c0_60, %c128_61] : memref<12x512xf32, #tpu.memory_space<vmem>>, vector<8x256xf32>
    tpu.vector_store %arg15[%c0_60, %c128_61], %98 {strides = array<i32>} : memref<12x512xf32, #tpu.memory_space<vmem>>, vector<8x256xf32>,
    %c0_62 = arith.constant 0 : index
    %c111_63 = arith.constant 111 : index
    %100 = vector.load %arg15[%c0_62, %c111_63] : memref<12x512xf32, #tpu.memory_space<vmem>>, vector<8x256xf32>
    %101 = vector.broadcast %22 : vector<1x256xf32> to vector<8x256xf32>
    %102 = arith.mulf %100, %101 : vector<8x256xf32>
    %c0_64 = arith.constant 0 : index
    %c0_65 = arith.constant 0 : index
    %103 = vector.load %arg16[%c0_64, %c0_65] : memref<108x256xf32, #tpu.memory_space<vmem>>, vector<8x256xf32>
    tpu.vector_store %arg16[%c0_64, %c0_65], %102 {strides = array<i32>} : memref<108x256xf32, #tpu.memory_space<vmem>>, vector<8x256xf32>,
    %c0_66 = arith.constant 0 : index
    %c112_67 = arith.constant 112 : index
    %104 = vector.load %arg15[%c0_66, %c112_67] : memref<12x512xf32, #tpu.memory_space<vmem>>, vector<8x256xf32>
    %c8_68 = arith.constant 8 : index
    %c0_69 = arith.constant 0 : index
    %105 = vector.load %arg16[%c8_68, %c0_69] : memref<108x256xf32, #tpu.memory_space<vmem>>, vector<8x256xf32>
    tpu.vector_store %arg16[%c8_68, %c0_69], %104 {strides = array<i32>} : memref<108x256xf32, #tpu.memory_space<vmem>>, vector<8x256xf32>,
    %c0_70 = arith.constant 0 : index
    %c113_71 = arith.constant 113 : index
    %106 = vector.load %arg15[%c0_70, %c113_71] : memref<12x512xf32, #tpu.memory_space<vmem>>, vector<8x256xf32>
    %107 = vector.broadcast %26 : vector<1x256xf32> to vector<8x256xf32>
    %108 = arith.mulf %106, %107 : vector<8x256xf32>
    %c16_72 = arith.constant 16 : index
    %c0_73 = arith.constant 0 : index
    %109 = vector.load %arg16[%c16_72, %c0_73] : memref<108x256xf32, #tpu.memory_space<vmem>>, vector<8x256xf32>
    tpu.vector_store %arg16[%c16_72, %c0_73], %108 {strides = array<i32>} : memref<108x256xf32, #tpu.memory_space<vmem>>, vector<8x256xf32>,
    %c0_74 = arith.constant 0 : index
    %c127_75 = arith.constant 127 : index
    %110 = vector.load %arg15[%c0_74, %c127_75] : memref<12x512xf32, #tpu.memory_space<vmem>>, vector<8x256xf32>
    %111 = vector.broadcast %22 : vector<1x256xf32> to vector<8x256xf32>
    %112 = arith.mulf %110, %111 : vector<8x256xf32>
    %c24_76 = arith.constant 24 : index
    %c0_77 = arith.constant 0 : index
    %113 = vector.load %arg16[%c24_76, %c0_77] : memref<108x256xf32, #tpu.memory_space<vmem>>, vector<8x256xf32>
    tpu.vector_store %arg16[%c24_76, %c0_77], %112 {strides = array<i32>} : memref<108x256xf32, #tpu.memory_space<vmem>>, vector<8x256xf32>,
    %c0_78 = arith.constant 0 : index
    %c128_79 = arith.constant 128 : index
    %114 = vector.load %arg15[%c0_78, %c128_79] : memref<12x512xf32, #tpu.memory_space<vmem>>, vector<8x256xf32>
    %c32_80 = arith.constant 32 : index
    %c0_81 = arith.constant 0 : index
    %115 = vector.load %arg16[%c32_80, %c0_81] : memref<108x256xf32, #tpu.memory_space<vmem>>, vector<8x256xf32>
    tpu.vector_store %arg16[%c32_80, %c0_81], %114 {strides = array<i32>} : memref<108x256xf32, #tpu.memory_space<vmem>>, vector<8x256xf32>,
    %c0_82 = arith.constant 0 : index
    %c129_83 = arith.constant 129 : index
    %116 = vector.load %arg15[%c0_82, %c129_83] : memref<12x512xf32, #tpu.memory_space<vmem>>, vector<8x256xf32>
    %117 = vector.broadcast %26 : vector<1x256xf32> to vector<8x256xf32>
    %118 = arith.mulf %116, %117 : vector<8x256xf32>
    %c40 = arith.constant 40 : index
    %c0_84 = arith.constant 0 : index
    %119 = vector.load %arg16[%c40, %c0_84] : memref<108x256xf32, #tpu.memory_space<vmem>>, vector<8x256xf32>
    tpu.vector_store %arg16[%c40, %c0_84], %118 {strides = array<i32>} : memref<108x256xf32, #tpu.memory_space<vmem>>, vector<8x256xf32>,
    %c0_85 = arith.constant 0 : index
    %c143_86 = arith.constant 143 : index
    %120 = vector.load %arg15[%c0_85, %c143_86] : memref<12x512xf32, #tpu.memory_space<vmem>>, vector<8x256xf32>
    %121 = vector.broadcast %22 : vector<1x256xf32> to vector<8x256xf32>
    %122 = arith.mulf %120, %121 : vector<8x256xf32>
    %c48 = arith.constant 48 : index
    %c0_87 = arith.constant 0 : index
    %123 = vector.load %arg16[%c48, %c0_87] : memref<108x256xf32, #tpu.memory_space<vmem>>, vector<8x256xf32>
    tpu.vector_store %arg16[%c48, %c0_87], %122 {strides = array<i32>} : memref<108x256xf32, #tpu.memory_space<vmem>>, vector<8x256xf32>,
    %c0_88 = arith.constant 0 : index
    %c144_89 = arith.constant 144 : index
    %124 = vector.load %arg15[%c0_88, %c144_89] : memref<12x512xf32, #tpu.memory_space<vmem>>, vector<8x256xf32>
    %c56 = arith.constant 56 : index
    %c0_90 = arith.constant 0 : index
    %125 = vector.load %arg16[%c56, %c0_90] : memref<108x256xf32, #tpu.memory_space<vmem>>, vector<8x256xf32>
    tpu.vector_store %arg16[%c56, %c0_90], %124 {strides = array<i32>} : memref<108x256xf32, #tpu.memory_space<vmem>>, vector<8x256xf32>,
    %c0_91 = arith.constant 0 : index
    %c145_92 = arith.constant 145 : index
    %126 = vector.load %arg15[%c0_91, %c145_92] : memref<12x512xf32, #tpu.memory_space<vmem>>, vector<8x256xf32>
    %127 = vector.broadcast %26 : vector<1x256xf32> to vector<8x256xf32>
    %128 = arith.mulf %126, %127 : vector<8x256xf32>
    %c64 = arith.constant 64 : index
    %c0_93 = arith.constant 0 : index
    %129 = vector.load %arg16[%c64, %c0_93] : memref<108x256xf32, #tpu.memory_space<vmem>>, vector<8x256xf32>
    tpu.vector_store %arg16[%c64, %c0_93], %128 {strides = array<i32>} : memref<108x256xf32, #tpu.memory_space<vmem>>, vector<8x256xf32>,
    %c0_94 = arith.constant 0 : index
    %c0_95 = arith.constant 0 : index
    %130 = vector.load %arg16[%c0_94, %c0_95] : memref<108x256xf32, #tpu.memory_space<vmem>>, vector<72x256xf32>
    %131 = arith.truncf %130 : vector<72x256xf32> to vector<72x256xbf16>
    %c0_96 = arith.constant 0 : index
    %c0_97 = arith.constant 0 : index
    %132 = vector.load %arg8[%c0_96, %c0_97] : memref<4x72xbf16, #tpu.memory_space<vmem>>, vector<4x72xbf16>
    %cst_98 = arith.constant dense<0.000000e+00> : vector<4x256xf32>
    %133 = tpu.matmul %132, %131, %cst_98 {dimension_numbers = #tpu.dot_dimension_numbers<[1], [0], [0], [1], [0, 0, 1, 1], [], []>} : vector<4x72xbf16>, vector<72x256xbf16>, vector<4x256xf32> -> vector<4x256xf32>
    %c0_99 = arith.constant 0 : index
    %c0_100 = arith.constant 0 : index
    %134 = vector.load %arg9[%c0_99, %c0_100] : memref<4x1xf32, #tpu.memory_space<vmem>>, vector<4x1xf32>
    %135 = vector.broadcast %134 : vector<4x1xf32> to vector<4x256xf32>
    %136 = arith.addf %133, %135 : vector<4x256xf32>
    %c0_101 = arith.constant 0 : index
    %c8_102 = arith.constant 8 : index
    %c0_103 = arith.constant 0 : index
    %137 = vector.load %arg14[%c0_101, %c8_102, %c0_103] : memref<1x16x256xf32, #tpu.memory_space<vmem>>, vector<1x4x256xf32>
    %138 = vector.shape_cast %137 : vector<1x4x256xf32> to vector<4x256xf32>
    %139 = vector.shape_cast %136 : vector<4x256xf32> to vector<1x4x256xf32>
    tpu.vector_store %arg14[%c0_101, %c8_102, %c0_103], %139 {strides = array<i32>} : memref<1x16x256xf32, #tpu.memory_space<vmem>>, vector<1x4x256xf32>,
    %c0_104 = arith.constant 0 : index
    %c0_105 = arith.constant 0 : index
    %c0_106 = arith.constant 0 : index
    %140 = vector.load %arg14[%c0_104, %c0_105, %c0_106] : memref<1x16x256xf32, #tpu.memory_space<vmem>>, vector<1x12x256xf32>
    %141 = vector.shape_cast %140 : vector<1x12x256xf32> to vector<12x256xf32>
    %c0_107 = arith.constant 0 : index
    %c0_108 = arith.constant 0 : index
    %142 = vector.load %arg10[%c0_107, %c0_108] : memref<12x1xf32, #tpu.memory_space<vmem>>, vector<12x1xf32>
    %143 = vector.broadcast %142 : vector<12x1xf32> to vector<12x256xf32>
    %144 = arith.mulf %141, %143 : vector<12x256xf32>
    %c0_109 = arith.constant 0 : index
    %c0_110 = arith.constant 0 : index
    %145 = vector.load %arg11[%c0_109, %c0_110] : memref<12x1xf32, #tpu.memory_space<vmem>>, vector<12x1xf32>
    %146 = vector.broadcast %145 : vector<12x1xf32> to vector<12x256xf32>
    %147 = arith.addf %144, %146 : vector<12x256xf32>
    %cst_111 = arith.constant 0.000000e+00 : f32
    %148 = vector.broadcast %cst_111 : f32 to vector<12x256xf32>
    %149 = arith.cmpf oge, %147, %148 : vector<12x256xf32>
    %cst_112 = arith.constant 2.000000e-01 : f32
    %150 = vector.broadcast %cst_112 : f32 to vector<12x256xf32>
    %151 = arith.mulf %150, %147 : vector<12x256xf32>
    %152 = arith.select %149, %147, %151 : vector<12x256xi1>, vector<12x256xf32>
    %c0_113 = arith.constant 0 : index
    %c128_114 = arith.constant 128 : index
    %153 = vector.load %arg15[%c0_113, %c128_114] : memref<12x512xf32, #tpu.memory_space<vmem>>, vector<12x256xf32>
    tpu.vector_store %arg15[%c0_113, %c128_114], %152 {strides = array<i32>} : memref<12x512xf32, #tpu.memory_space<vmem>>, vector<12x256xf32>,
    %c0_115 = arith.constant 0 : index
    %c111_116 = arith.constant 111 : index
    %154 = vector.load %arg15[%c0_115, %c111_116] : memref<12x512xf32, #tpu.memory_space<vmem>>, vector<12x256xf32>
    %155 = vector.broadcast %22 : vector<1x256xf32> to vector<12x256xf32>
    %156 = arith.mulf %154, %155 : vector<12x256xf32>
    %c0_117 = arith.constant 0 : index
    %c0_118 = arith.constant 0 : index
    %157 = vector.load %arg16[%c0_117, %c0_118] : memref<108x256xf32, #tpu.memory_space<vmem>>, vector<12x256xf32>
    tpu.vector_store %arg16[%c0_117, %c0_118], %156 {strides = array<i32>} : memref<108x256xf32, #tpu.memory_space<vmem>>, vector<12x256xf32>,
    %c0_119 = arith.constant 0 : index
    %c112_120 = arith.constant 112 : index
    %158 = vector.load %arg15[%c0_119, %c112_120] : memref<12x512xf32, #tpu.memory_space<vmem>>, vector<12x256xf32>
    %c12_121 = arith.constant 12 : index
    %c0_122 = arith.constant 0 : index
    %159 = vector.load %arg16[%c12_121, %c0_122] : memref<108x256xf32, #tpu.memory_space<vmem>>, vector<12x256xf32>
    tpu.vector_store %arg16[%c12_121, %c0_122], %158 {strides = array<i32>} : memref<108x256xf32, #tpu.memory_space<vmem>>, vector<12x256xf32>,
    %c0_123 = arith.constant 0 : index
    %c113_124 = arith.constant 113 : index
    %160 = vector.load %arg15[%c0_123, %c113_124] : memref<12x512xf32, #tpu.memory_space<vmem>>, vector<12x256xf32>
    %161 = vector.broadcast %26 : vector<1x256xf32> to vector<12x256xf32>
    %162 = arith.mulf %160, %161 : vector<12x256xf32>
    %c24_125 = arith.constant 24 : index
    %c0_126 = arith.constant 0 : index
    %163 = vector.load %arg16[%c24_125, %c0_126] : memref<108x256xf32, #tpu.memory_space<vmem>>, vector<12x256xf32>
    tpu.vector_store %arg16[%c24_125, %c0_126], %162 {strides = array<i32>} : memref<108x256xf32, #tpu.memory_space<vmem>>, vector<12x256xf32>,
    %c0_127 = arith.constant 0 : index
    %c127_128 = arith.constant 127 : index
    %164 = vector.load %arg15[%c0_127, %c127_128] : memref<12x512xf32, #tpu.memory_space<vmem>>, vector<12x256xf32>
    %165 = vector.broadcast %22 : vector<1x256xf32> to vector<12x256xf32>
    %166 = arith.mulf %164, %165 : vector<12x256xf32>
    %c36 = arith.constant 36 : index
    %c0_129 = arith.constant 0 : index
    %167 = vector.load %arg16[%c36, %c0_129] : memref<108x256xf32, #tpu.memory_space<vmem>>, vector<12x256xf32>
    tpu.vector_store %arg16[%c36, %c0_129], %166 {strides = array<i32>} : memref<108x256xf32, #tpu.memory_space<vmem>>, vector<12x256xf32>,
    %c0_130 = arith.constant 0 : index
    %c128_131 = arith.constant 128 : index
    %168 = vector.load %arg15[%c0_130, %c128_131] : memref<12x512xf32, #tpu.memory_space<vmem>>, vector<12x256xf32>
    %c48_132 = arith.constant 48 : index
    %c0_133 = arith.constant 0 : index
    %169 = vector.load %arg16[%c48_132, %c0_133] : memref<108x256xf32, #tpu.memory_space<vmem>>, vector<12x256xf32>
    tpu.vector_store %arg16[%c48_132, %c0_133], %168 {strides = array<i32>} : memref<108x256xf32, #tpu.memory_space<vmem>>, vector<12x256xf32>,
    %c0_134 = arith.constant 0 : index
    %c129_135 = arith.constant 129 : index
    %170 = vector.load %arg15[%c0_134, %c129_135] : memref<12x512xf32, #tpu.memory_space<vmem>>, vector<12x256xf32>
    %171 = vector.broadcast %26 : vector<1x256xf32> to vector<12x256xf32>
    %172 = arith.mulf %170, %171 : vector<12x256xf32>
    %c60 = arith.constant 60 : index
    %c0_136 = arith.constant 0 : index
    %173 = vector.load %arg16[%c60, %c0_136] : memref<108x256xf32, #tpu.memory_space<vmem>>, vector<12x256xf32>
    tpu.vector_store %arg16[%c60, %c0_136], %172 {strides = array<i32>} : memref<108x256xf32, #tpu.memory_space<vmem>>, vector<12x256xf32>,
    %c0_137 = arith.constant 0 : index
    %c143_138 = arith.constant 143 : index
    %174 = vector.load %arg15[%c0_137, %c143_138] : memref<12x512xf32, #tpu.memory_space<vmem>>, vector<12x256xf32>
    %175 = vector.broadcast %22 : vector<1x256xf32> to vector<12x256xf32>
    %176 = arith.mulf %174, %175 : vector<12x256xf32>
    %c72 = arith.constant 72 : index
    %c0_139 = arith.constant 0 : index
    %177 = vector.load %arg16[%c72, %c0_139] : memref<108x256xf32, #tpu.memory_space<vmem>>, vector<12x256xf32>
    tpu.vector_store %arg16[%c72, %c0_139], %176 {strides = array<i32>} : memref<108x256xf32, #tpu.memory_space<vmem>>, vector<12x256xf32>,
    %c0_140 = arith.constant 0 : index
    %c144_141 = arith.constant 144 : index
    %178 = vector.load %arg15[%c0_140, %c144_141] : memref<12x512xf32, #tpu.memory_space<vmem>>, vector<12x256xf32>
    %c84 = arith.constant 84 : index
    %c0_142 = arith.constant 0 : index
    %179 = vector.load %arg16[%c84, %c0_142] : memref<108x256xf32, #tpu.memory_space<vmem>>, vector<12x256xf32>
    tpu.vector_store %arg16[%c84, %c0_142], %178 {strides = array<i32>} : memref<108x256xf32, #tpu.memory_space<vmem>>, vector<12x256xf32>,
    %c0_143 = arith.constant 0 : index
    %c145_144 = arith.constant 145 : index
    %180 = vector.load %arg15[%c0_143, %c145_144] : memref<12x512xf32, #tpu.memory_space<vmem>>, vector<12x256xf32>
    %181 = vector.broadcast %26 : vector<1x256xf32> to vector<12x256xf32>
    %182 = arith.mulf %180, %181 : vector<12x256xf32>
    %c96 = arith.constant 96 : index
    %c0_145 = arith.constant 0 : index
    %183 = vector.load %arg16[%c96, %c0_145] : memref<108x256xf32, #tpu.memory_space<vmem>>, vector<12x256xf32>
    tpu.vector_store %arg16[%c96, %c0_145], %182 {strides = array<i32>} : memref<108x256xf32, #tpu.memory_space<vmem>>, vector<12x256xf32>,
    %c0_146 = arith.constant 0 : index
    %c0_147 = arith.constant 0 : index
    %184 = vector.load %arg16[%c0_146, %c0_147] : memref<108x256xf32, #tpu.memory_space<vmem>>, vector<108x256xf32>
    %185 = arith.truncf %184 : vector<108x256xf32> to vector<108x256xbf16>
    %c0_148 = arith.constant 0 : index
    %c0_149 = arith.constant 0 : index
    %186 = vector.load %arg12[%c0_148, %c0_149] : memref<4x108xbf16, #tpu.memory_space<vmem>>, vector<4x108xbf16>
    %cst_150 = arith.constant dense<0.000000e+00> : vector<4x256xf32>
    %187 = tpu.matmul %186, %185, %cst_150 {dimension_numbers = #tpu.dot_dimension_numbers<[1], [0], [0], [1], [0, 0, 1, 1], [], []>} : vector<4x108xbf16>, vector<108x256xbf16>, vector<4x256xf32> -> vector<4x256xf32>
    %c0_151 = arith.constant 0 : index
    %c0_152 = arith.constant 0 : index
    %188 = vector.load %arg13[%c0_151, %c0_152] : memref<4x1xf32, #tpu.memory_space<vmem>>, vector<4x1xf32>
    %189 = vector.broadcast %188 : vector<4x1xf32> to vector<4x256xf32>
    %190 = arith.addf %187, %189 : vector<4x256xf32>
    %c0_153 = arith.constant 0 : index
    %c12_154 = arith.constant 12 : index
    %c0_155 = arith.constant 0 : index
    %191 = vector.load %arg14[%c0_153, %c12_154, %c0_155] : memref<1x16x256xf32, #tpu.memory_space<vmem>>, vector<1x4x256xf32>
    %192 = vector.shape_cast %191 : vector<1x4x256xf32> to vector<4x256xf32>
    %193 = vector.shape_cast %190 : vector<4x256xf32> to vector<1x4x256xf32>
    tpu.vector_store %arg14[%c0_153, %c12_154, %c0_155], %193 {strides = array<i32>} : memref<1x16x256xf32, #tpu.memory_space<vmem>>, vector<1x4x256xf32>,
    return
  }
  func.func @transform_0(%arg0: i32) -> (i32, i32, i32) {
    %c0_i32 = arith.constant 0 : i32
    %c0_i32_0 = arith.constant 0 : i32
    %c0_i32_1 = arith.constant 0 : i32
    return %arg0, %c0_i32, %c0_i32_0 : i32, i32, i32
  }
  func.func @transform_1(%arg0: i32) -> (i32, i32) {
    %c0_i32 = arith.constant 0 : i32
    %c0_i32_0 = arith.constant 0 : i32
    %c0_i32_1 = arith.constant 0 : i32
    return %c0_i32, %c0_i32_0 : i32, i32
  }
  func.func @transform_2(%arg0: i32) -> (i32, i32) {
    %c0_i32 = arith.constant 0 : i32
    %c0_i32_0 = arith.constant 0 : i32
    %c0_i32_1 = arith.constant 0 : i32
    return %c0_i32, %c0_i32_0 : i32, i32
  }
  func.func @transform_3(%arg0: i32) -> (i32, i32) {
    %c0_i32 = arith.constant 0 : i32
    %c0_i32_0 = arith.constant 0 : i32
    %c0_i32_1 = arith.constant 0 : i32
    return %c0_i32, %c0_i32_0 : i32, i32
  }
  func.func @transform_4(%arg0: i32) -> (i32, i32) {
    %c0_i32 = arith.constant 0 : i32
    %c0_i32_0 = arith.constant 0 : i32
    %c0_i32_1 = arith.constant 0 : i32
    return %c0_i32, %c0_i32_0 : i32, i32
  }
  func.func @transform_5(%arg0: i32) -> (i32, i32) {
    %c0_i32 = arith.constant 0 : i32
    %c0_i32_0 = arith.constant 0 : i32
    %c0_i32_1 = arith.constant 0 : i32
    return %c0_i32, %c0_i32_0 : i32, i32
  }
  func.func @transform_6(%arg0: i32) -> (i32, i32) {
    %c0_i32 = arith.constant 0 : i32
    %c0_i32_0 = arith.constant 0 : i32
    %c0_i32_1 = arith.constant 0 : i32
    return %c0_i32, %c0_i32_0 : i32, i32
  }
  func.func @transform_7(%arg0: i32) -> (i32, i32) {
    %c0_i32 = arith.constant 0 : i32
    %c0_i32_0 = arith.constant 0 : i32
    %c0_i32_1 = arith.constant 0 : i32
    return %c0_i32, %c0_i32_0 : i32, i32
  }
  func.func @transform_8(%arg0: i32) -> (i32, i32) {
    %c0_i32 = arith.constant 0 : i32
    %c0_i32_0 = arith.constant 0 : i32
    %c0_i32_1 = arith.constant 0 : i32
    return %c0_i32, %c0_i32_0 : i32, i32
  }
  func.func @transform_9(%arg0: i32) -> (i32, i32) {
    %c0_i32 = arith.constant 0 : i32
    %c0_i32_0 = arith.constant 0 : i32
    %c0_i32_1 = arith.constant 0 : i32
    return %c0_i32, %c0_i32_0 : i32, i32
  }
  func.func @transform_10(%arg0: i32) -> (i32, i32) {
    %c0_i32 = arith.constant 0 : i32
    %c0_i32_0 = arith.constant 0 : i32
    %c0_i32_1 = arith.constant 0 : i32
    return %c0_i32, %c0_i32_0 : i32, i32
  }
  func.func @transform_11(%arg0: i32) -> (i32, i32) {
    %c0_i32 = arith.constant 0 : i32
    %c0_i32_0 = arith.constant 0 : i32
    %c0_i32_1 = arith.constant 0 : i32
    return %c0_i32, %c0_i32_0 : i32, i32
  }
  func.func @transform_12(%arg0: i32) -> (i32, i32) {
    %c0_i32 = arith.constant 0 : i32
    %c0_i32_0 = arith.constant 0 : i32
    %c0_i32_1 = arith.constant 0 : i32
    return %c0_i32, %c0_i32_0 : i32, i32
  }
  func.func @transform_13(%arg0: i32) -> (i32, i32, i32) {
    %c0_i32 = arith.constant 0 : i32
    %c0_i32_0 = arith.constant 0 : i32
    %c0_i32_1 = arith.constant 0 : i32
    return %arg0, %c0_i32, %c0_i32_0 : i32, i32, i32
  }
}

</mosaic_0001>

<bundles_post_ra>
// kernel: tpu_custom_call.1
= control target key start
LH: loop header
LB: loop body
LE: loop exit
PB: predicated region body
PF: predicated region fallthrough
CT: control target
= control target key end

     0   :  { %s2670_s0 = inlined_call_operand.vmem [shape: f32[2,4,256], index: 0, kind: input, shape index: {}]   ;;  %s2671_s1 = inlined_call_operand.vmem [shape: f32[4,1], index: 1, kind: input, shape index: {}]   ;;  %s2672_s2 = inlined_call_operand.vmem [shape: f32[4,1], index: 2, kind: input, shape index: {}]   ;;  %s2673_s3 = inlined_call_operand.vmem [shape: bf16[4,36], index: 3, kind: input, shape index: {}]   ;;  %s2674_s4 = inlined_call_operand.vmem [shape: f32[4,1], index: 4, kind: input, shape index: {}]   ;;  %s2675_s5 = inlined_call_operand.vmem [shape: f32[8,1], index: 5, kind: input, shape index: {}]   ;;  %s2676_s6 = inlined_call_operand.vmem [shape: f32[8,1], index: 6, kind: input, shape index: {}]   ;;  %s2677_s7 = inlined_call_operand.vmem [shape: bf16[4,72], index: 7, kind: input, shape index: {}]   ;;  %s2678_s8 = inlined_call_operand.vmem [shape: f32[4,1], index: 8, kind: input, shape index: {}]   ;;  %s2679_s9 = inlined_call_operand.vmem [shape: f32[12,1], index: 9, kind: input, shape index: {}]   ;;  %s2680_s10 = inlined_call_operand.vmem [shape: f32[12,1], index: 10, kind: input, shape index: {}]   ;;  %s2681_s11 = inlined_call_operand.vmem [shape: bf16[4,108], index: 11, kind: input, shape index: {}]   ;;  %s2682_s12 = inlined_call_operand.vmem [shape: f32[4,1], index: 12, kind: input, shape index: {}]   ;;  %s2683_s13 = inlined_call_operand.hbm [shape: f32[2,16,256], index: 13, kind: output, shape index: {}]  }
   0x1   :  { %2701 = sst [smem:[#allocation7_spill]] %s2670_s0 }
   0x2   :  { %2702 = sst [smem:[#allocation8_spill]] %s2671_s1 }
   0x3   :  { %2703 = sst [smem:[#allocation9_spill]] %s2672_s2 }
   0x4   :  { %2704 = sst [smem:[#allocation10_spill]] %s2673_s3 }
   0x5   :  { %2705 = sst [smem:[#allocation11_spill]] %s2674_s4 }
   0x6   :  { %2706 = sst [smem:[#allocation12_spill]] %s2675_s5 }
   0x7   :  { %18 = vsyncpa [#allocation5], 0 }
   0x8   :  { %20 = vsyncpa [#allocation5 + $0x1], 0  ;;  %s1982_s25 = smov 0   ;;  %s1984_s26 = smov 0  }
   0x9   :  { %s1986_s27 = smov 0   ;;  %s1988_s28 = smov 0  }
   0xa LB: > { %s2003_s29 = sadd.s32 4294967295, %s1898_s28   ;;  %s1726_s30 = sadd.s32 4294967294, %s1898_s28   ;;  %s1898_s28 = sphi %s1988_s28, %s2727_s28   ;;  %s1894_s27 = sphi %s1986_s27, %s2726_s27   ;;  %s1890_s26 = sphi %s1984_s26, %s2725_s26   ;;  %s1886_s25 = sphi %s1982_s25, %s2724_s25  }
   0xb   : > { %s2007_s14 = sadd.s32 1, %s1898_s28   ;;  %s311_s15 = sadd.s32 1, %s1894_s27 }
   0xc   : > { %s308_s16 = ssub.s32 %s1898_s28, %s2007_s14  ;;  %p321_p0 = scmp.ne.s32.totalorder %s1894_s27, %s1890_s26 }
   0xd   : > { %p309_p1 = scmp.eq.s32.totalorder %s308_s16, 0  ;;  %p322_p2 = scmp.eq.s32.totalorder %s2003_s29, 1 }
   0xe   : > { %p327_p3 = scmp.ne.s32.totalorder %s1890_s26, %s1886_s25  ;;  %p328_p4 = scmp.eq.s32.totalorder %s1726_s30, 1 }
   0xf   : > { %s2018_s17 = scalar_select %p309_p1, %s1894_s27, %s311_s15  }
  0x10   : > { %p2020_p5 = por %p322_p2, %p321_p0  ;;  %p2024_p6 = por %p328_p4, %p327_p3 }
  0x11   : > { %p1729_p7 = scmp.ge.s32.totalorder %s1898_s28, 1  ;;  %p390_p8 = scmp.lt.s32.totalorder %s1898_s28, 3 }
  0x13   : > { %p391_p9 = pnand %p1729_p7, %p390_p8 }
  0x14   : > { %s2709_s1 = sld [smem:[#allocation8_spill]] (!%p391_p9)  ;;  %s2684_s24 = sand.u32 (!%p391_p9), 1, %s1890_s26  }
  0x15   : > { %394 = sbr.rel (%p391_p9) target bundleno = 1323 (0x52b), region = 72  ;;  %s2710_s2 = sld [smem:[#allocation9_spill]] (!%p391_p9) }
  0x16   : > { %p434_p10 = scmp.lt.s32.totalorder (!%p391_p9), %s2003_s29, 1  ;;  %s1730_s30 = sshll.u32 (!%p391_p9), %s2684_s24, 5 }
  0x17   : > { %s2711_s0 = sld [smem:[#allocation7_spill]] (!%p391_p9)  ;;  %s2685_s23 = smov (!%p391_p9), 17  }
  0x18   : > { %s2697_s24 = smov (!%p391_p9), 15   ;;  %s2689_s20 = smov (!%p391_p9), 127  }
  0x19   : > { %s2691_s21 = smov (!%p391_p9), 112   ;;  %s2712_s4 = sld [smem:[#allocation11_spill]] (!%p391_p9) }
  0x1a   : > { %v495_v0 = vld [vmem:[%s2709_s1] sm:$0xf]  ;;  %v448_v1 = vlaneseq  ;;  %v1900_v2 = vmov 0   ;;  %v1901_v3 = vmov 0.0   ;;  %s435_s15 = scalar_select %p434_p10, %s2003_s29, 1  ;;  %vm545_vm6 = vcmask 138240  }
  0x1b   : > { %1800 = vset.pattern.permute.xlu0 %v1900_v2  ;;  %440 = vst [vmem:[#allocation2 + $0x30] sm:$0xff] %v1901_v3  ;;  %441 = vst [vmem:[#allocation2] sm:$0xff] %v1901_v3  ;;  %1831 = vset.pattern.permute.xlu1 %v1900_v2  ;;  %v503_v5 = vld [vmem:[%s2710_s2] sm:$0xf]  ;;  %s2062_s1 = scalar_lea.vmem [#allocation4], %s1730_s30  ;;  %s2693_s30 = smov 113  }
  0x1c   : > { %442 = vst [vmem:[#allocation2 + $0x18] sm:$0xff] %v1901_v3  ;;  %443 = vst [vmem:[#allocation2 + $0x10] sm:$0xff] %v1901_v3  ;;  %498 = vperm.xlu0 %1800, %v495_v0   ;;  %v449_v4 = vand.u32 127, %v448_v1  ;;  %823 = vmatprep.mubr.bf16.mxu1 %v1900_v2  ;;  %s1748_s16 = sshll.u32 %s435_s15, 3  ;;  %s2699_s15 = smov 1   ;;  %vm600_vm7 = vcmask 121856  }
  0x1d   : > { %444 = vst [vmem:[#allocation2 + $0x8] sm:$0xf] %v1901_v3  ;;  %445 = vst [vmem:[#allocation2 + $0x20] sm:$0xf] %v1901_v3  ;;  %1633 = vmatprep.mubr.bf16.mxu0 %v1900_v2  ;;  %s438_s22 = scalar_lea.vmem %s2711_s0, %s1748_s16  ;;  %s2695_s16 = smov 111   ;;  %vm1071_vm8 = vcmask 1043456  }
  0x1e   : > { %446 = vst [vmem:[#allocation2 + $0x28] sm:$0xf] %v1901_v3  ;;  %447 = vst [vmem:[#allocation2 + $0x38] sm:$0xf] %v1901_v3  ;;  %v450_v6 = vadd.s32 128, %v449_v4  ;;  %v455_v7 = vand.u32 15, %v449_v4 }
  0x1f   : > { %v487_v15 = vld [vmem:[%s438_s22] sm:$0xff]  ;;  %s2687_s22 = smov 16   ;;  %vm528_vm9 = vcmask 908288   ;;  %vm634_vm10 = vcmask 7168   ;;  %vm583_vm11 = vcmask 924672   ;;  %vm614_vm12 = vcmask 1039360  }
  0x20   : > { %506 = vperm.xlu0 %1800, %v503_v5   ;;  %v462_v8 = vand.u32 15, %v450_v6  ;;  %vm481_vm0 = vcmp.le.s32.totalorder %v455_v7, 14  ;;  %vm475_vm1 = vcmp.ge.s32.totalorder %v455_v7, 1  ;;  %v489_v16 = vcombine.high %v487_v15, %v487_v15  ;;  %491 = vst [vmem:[%s2062_s1] sm:$0xf] %v487_v15  ;;  %s2713_s5 = sld [smem:[#allocation12_spill]]  ;;  %s2722_s0 = smov 1  }
  0x21   : > { %v1735_v9 = vsel %vm481_vm0, 1.0, %v1901_v3  ;;  %v1733_v10 = vsel %vm475_vm1, 1.0, %v1901_v3  ;;  %vm721_vm13 = vcmask 916480   ;;  %vm784_vm14 = vcmask 1041408   ;;  %s2719_s3 = sld [smem:[#allocation10_spill]]  ;;  %s1910_s2 = smov [#allocation4]  }
  0x22   : > { %vm482_vm2 = vcmp.le.s32.totalorder %v462_v8, 14  ;;  %vm476_vm3 = vcmp.ge.s32.totalorder %v462_v8, 1  ;;  %492 = vst [vmem:[%s2062_s1 + $0x8] sm:$0xf] %v489_v16  ;;  %v552_v19 = vld [vmem:[#allocation2 + $0x30] sm:$0xf] }
  0x23   : > { %v1736_v11 = vsel %vm482_vm2, 1.0, %v1901_v3  ;;  %v1734_v12 = vsel %vm476_vm3, 1.0, %v1901_v3  ;;  %v708_v17 = vld [vmem:[#allocation2 + $0x10] sm:$0xf]  ;;  %v558_v20 = vrot.slane %v552_v19, 4  ;;  %vm567_vm15 = vcmask 130048  }
  0x24   : > { %v1801_v13 = vpack.i.bf16 %v1736_v11, %v1735_v9  ;;  %v1811_v14 = vpack.i.bf16 %v1734_v12, %v1733_v10  ;;  %v714_v18 = vrot.slane %v708_v17, 4  ;;  %v1305_v40 = vld [vmem:[#allocation2 + $0x8] sm:$0xf]  ;;  %v519_v42 = vld [vmem:[#allocation2 + $0x30] sm:$0xf]  ;;  %vm780_vm0 = vcmask 293888  }
  0x25   : > { %v730_v48 = vld [vmem:[#allocation2 + $0x10] sm:$0xf]  ;;  %vm1067_vm3 = vcmask 588800  }
  0x26   : > { %1802 = vrot.lane.b32.xlu1 %v1801_v13, %s2685_s23  ;;  %1812 = vrot.lane.b32.xlu0 %v1811_v14, %s2697_s24  ;;  %v647_v54 = vld [vmem:[#allocation2 + $0x10] sm:$0xf] }
  0x27   : > { %v493_v22 = vld [vmem:[%s2062_s1] sm:$0xf]  ;;  %v679_v59 = vld [vmem:[#allocation2 + $0x10] sm:$0xf] }
  0x29   : > { %v494_v23 = vld [vmem:[%s2062_s1 + $0x8] sm:$0xf] }
  0x2a   : > { %1807 = vrot.lane.b32.xlu1 %v1801_v13, %s2699_s15  ;;  %1822 = vrot.lane.b32.xlu0 %v1811_v14, %s2695_s16 }
  0x2e   : > { %1817 = vrot.lane.b32.xlu1 %v1811_v14, %s2689_s20  ;;  %719 = vrot.lane.b32.xlu0 %v714_v18, %s2691_s21 }
  0x32   : > { %1827 = vrot.lane.b32.xlu1 %v1801_v13, %s2693_s30 }
  0x36   : > { %561 = vrot.lane.b32.xlu1 %v558_v20, %s2687_s22 }
  0x97   : > { %v499_v21 = vpop.permute.xlu0 %498 }
  0x98   : > { %v1803_v24 = vpop.permute.xlu1 %1802  ;;  %v501_v25 = vmul.f32 %v499_v21, %v493_v22  ;;  %v502_v26 = vmul.f32 %v499_v21, %v494_v23 }
  0x99   : > { %v2081_v38 = vunpack.i.h.bf16 %v1803_v24  ;;  %v2083_v39 = vunpack.i.l.bf16 %v1803_v24 }
  0x9b   : > { %v507_v27 = vpop.permute.xlu0 %506  ;;  %v2095_v47 = vsel %vm545_vm6, %v2083_v39, %v2081_v38  ;;  %v741_v57 = vmul.f32 %v2081_v38, %v730_v48 }
  0x9c   : > { %v509_v28 = vadd.f32 %v507_v27, %v501_v25  ;;  %v510_v29 = vadd.f32 %v507_v27, %v502_v26  ;;  %v2074_v30 = vpop.permute.xlu1 %1807 }
  0x9d   : > { %v2105_v56 = vunpack.i.h.bf16 %v2074_v30  ;;  %v2134_v16 = vunpack.i.l.bf16 %v2074_v30 }
  0x9e   : > { %vm511_vm4 = vcmp.ge.f32.partialorder %v509_v28, 0.0  ;;  %vm512_vm5 = vcmp.ge.f32.partialorder %v510_v29, 0.0  ;;  %v513_v31 = vmul.f32 0.2, %v509_v28  ;;  %v514_v32 = vmul.f32 0.2, %v510_v29 }
  0x9f   : > { %v1813_v33 = vpop.permute.xlu0 %1812  ;;  %v658_v62 = vmul.f32 %v2105_v56, %v647_v54  ;;  %v2150_v27 = vsel %vm634_vm10, %v2134_v16, %v2105_v56 }
  0xa0   : > { %v515_v34 = vsel %vm511_vm4, %v509_v28, %v513_v31  ;;  %v516_v35 = vsel %vm512_vm5, %v510_v29, %v514_v32  ;;  %v2076_v36 = vpop.permute.xlu1 %1817  ;;  %v2098_v50 = vunpack.i.h.bf16 %v1813_v33  ;;  %v2100_v51 = vunpack.i.l.bf16 %v1813_v33 }
  0xa1   : > { %517 = vst [vmem:[#allocation2] sm:$0xf] %v515_v34  ;;  %518 = vst [vmem:[#allocation2 + $0x18] sm:$0xf] %v516_v35  ;;  %v2079_v37 = vunpack.i.l.bf16 %v2076_v36  ;;  %v664_v6 = vrot.slane %v658_v62, 4  ;;  %v2153_v28 = vunpack.i.h.bf16 %v2076_v36 }
  0xa2   : > { %v2118_v61 = vsel %vm600_vm7, %v2100_v51, %v2098_v50  ;;  %v690_v0 = vmul.f32 %v2098_v50, %v679_v59 }
  0xa3   : > { %v1823_v41 = vpop.permute.xlu0 %1822  ;;  %v2086_v43 = vmul.f32 0.0, %v2079_v37  ;;  %v1311_v45 = vmul.f32 %v2079_v37, %v1305_v40 }
  0xa4   : > { %v2088_v44 = vunpack.i.l.bf16 %v1823_v41  ;;  %v2127_v10 = vunpack.i.h.bf16 %v1823_v41  ;;  %v1828_v17 = vpop.permute.xlu1 %1827  ;;  %v2170_v41 = vsel %vm614_vm12, %v2079_v37, %v2153_v28 }
  0xa5   : > { %v1320_v49 = vrot.slane %v2086_v43, 4  ;;  %v1323_v55 = vrot.slane %v1311_v45, 4  ;;  %v2144_v22 = vunpack.i.h.bf16 %v1828_v17  ;;  %v2155_v29 = vunpack.i.l.bf16 %v1828_v17 }
  0xa6   : > { %v533_v46 = vmul.f32 %v2088_v44, %v519_v42  ;;  %v2141_v21 = vsel %vm528_vm9, %v2088_v44, %v2127_v10 }
  0xa7   : > { %v2112_v60 = vsel %vm1071_vm8, %v1320_v49, %v1323_v55  ;;  %v2165_v36 = vsel %vm583_vm11, %v2155_v29, %v2144_v22 }
  0xa8   : > { %539 = vrot.lane.b32.xlu0 %v533_v46, %s2685_s23  ;;  %v729_v52 = vld [vmem:[#allocation2 + $0x18] sm:$0xf]  ;;  %v641_v5 = vld [vmem:[#allocation2] sm:$0xf] }
  0xa9   : > { %v740_v53 = vmul.f32 %v2095_v47, %v729_v52  ;;  %v678_v58 = vld [vmem:[#allocation2 + $0x18] sm:$0xf]  ;;  %643 = vst [vmem:[#allocation3 + $0xb8] sm:$0xf] %v641_v5  ;;  %v706_v8 = vld [vmem:[#allocation2] sm:$0xf] }
  0xaa   : > { %v689_v63 = vmul.f32 %v2118_v61, %v678_v58  ;;  %v707_v1 = vld [vmem:[#allocation2 + $0x18] sm:$0xf]  ;;  %v728_v9 = vld [vmem:[#allocation2] sm:$0xf]  ;;  %v712_v11 = vrot.slane %v706_v8, 4  ;;  %v2196_v5 = vmul.f32 0.0, %v2081_v38 }
  0xab   : > { %747 = vrot.lane.b32.xlu1 %v740_v53, %s2695_s16  ;;  %v642_v4 = vld [vmem:[#allocation2 + $0x18] sm:$0xf]  ;;  %v713_v7 = vrot.slane %v707_v1, 4  ;;  %v739_v12 = vmul.f32 %v2083_v39, %v728_v9  ;;  %v677_v14 = vld [vmem:[#allocation2] sm:$0xf]  ;;  %v2215_v8 = vmul.f32 0.0, %v2155_v29  ;;  %v720_v9 = vpop.permute.xlu0 %719 }
  0xac   : > { %749 = vrot.lane.b32.xlu0 %v741_v57, %s2695_s16  ;;  %644 = vst [vmem:[#allocation3 + $0xd0] sm:$0xf] %v642_v4  ;;  %v521_v13 = vld [vmem:[#allocation2 + $0x18] sm:$0xf]  ;;  %v688_v18 = vmul.f32 %v2100_v51, %v677_v14  ;;  %v520_v20 = vld [vmem:[#allocation2] sm:$0xf] }
  0xad   : > { %v535_v15 = vmul.f32 %v2127_v10, %v521_v13  ;;  %v554_v19 = vld [vmem:[#allocation2 + $0x18] sm:$0xf]  ;;  %v534_v24 = vmul.f32 %v2141_v21, %v520_v20  ;;  %v553_v30 = vld [vmem:[#allocation2] sm:$0xf]  ;;  %v607_v57 = vld [vmem:[#allocation2 + $0x30] sm:$0xf] }
  0xae   : > { %v560_v23 = vrot.slane %v554_v19, 4  ;;  %v576_v25 = vld [vmem:[#allocation2 + $0x18] sm:$0xf]  ;;  %v559_v33 = vrot.slane %v553_v30, 4  ;;  %v645_v34 = vld [vmem:[#allocation2] sm:$0xf]  ;;  %v619_v62 = vmul.f32 %v2079_v37, %v607_v57 }
  0xaf   : > { %696 = vrot.lane.b32.xlu1 %v689_v63, %s2693_s30  ;;  %v646_v26 = vld [vmem:[#allocation2 + $0x18] sm:$0xf]  ;;  %v590_v31 = vmul.f32 %v2144_v22, %v576_v25  ;;  %v575_v35 = vld [vmem:[#allocation2] sm:$0xf]  ;;  %v656_v45 = vmul.f32 %v2134_v16, %v645_v34  ;;  %v574_v58 = vld [vmem:[#allocation2 + $0x30] sm:$0xf] }
  0xb0   : > { %698 = vrot.lane.b32.xlu0 %v690_v0, %s2693_s30  ;;  %v657_v32 = vmul.f32 %v2150_v27, %v646_v26  ;;  %v608_v40 = vld [vmem:[#allocation2] sm:$0xf]  ;;  %v589_v46 = vmul.f32 %v2165_v36, %v575_v35  ;;  %v609_v52 = vld [vmem:[#allocation2 + $0x18] sm:$0xf]  ;;  %v588_v63 = vmul.f32 %v2155_v29, %v574_v58  ;;  %v625_v0 = vrot.slane %v619_v62, 4 }
  0xb1   : > { %v620_v48 = vmul.f32 %v2170_v41, %v608_v40  ;;  %v662_v53 = vrot.slane %v656_v45, 4  ;;  %v621_v54 = vmul.f32 %v2153_v28, %v609_v52  ;;  %v774_v1 = vld [vmem:[%s2712_s4] sm:$0xf] }
  0xb2   : > { %v663_v42 = vrot.slane %v657_v32, 4  ;;  %v842_v4 = vld [vmem:[%s2713_s5] sm:$0xff] }
  0xb3   : > { %717 = vrot.lane.b32.xlu1 %v713_v7, %s2691_s21  ;;  %v626_v55 = vrot.slane %v620_v48, 4  ;;  %v627_v59 = vrot.slane %v621_v54, 4  ;;  %v850_v37 = vld [vmem:[%s2676_s6] sm:$0xff]  ;;  %v2210_v7 = vmul.f32 0.0, %v2105_v56 }
  0xb4   : > { %669 = vrot.lane.b32.xlu0 %v664_v6, %s2689_s20  ;;  %v2203_v6 = vmul.f32 0.0, %v2098_v50 }
  0xb7   : > { %715 = vrot.lane.b32.xlu1 %v712_v11, %s2691_s21  ;;  %s2718_s21 = smov 15   ;;  %v562_v11 = vpop.permute.xlu1 %561 }
  0xb8   : > { %745 = vrot.lane.b32.xlu0 %v739_v12, %s2695_s16  ;;  %s2717_s16 = smov 127  }
  0xbb   : > { %543 = vrot.lane.b32.xlu1 %v535_v15, %s2685_s23 }
  0xbc   : > { %694 = vrot.lane.b32.xlu0 %v688_v18, %s2693_s30  ;;  %s2720_s30 = smov 16  }
  0xbf   : > { %565 = vrot.lane.b32.xlu1 %v560_v23, %s2687_s22 }
  0xc0   : > { %541 = vrot.lane.b32.xlu0 %v534_v24, %s2685_s23  ;;  %s2715_s23 = smov 113  }
  0xc3   : > { %598 = vrot.lane.b32.xlu1 %v590_v31, %s2697_s24 }
  0xc4   : > { %563 = vrot.lane.b32.xlu0 %v559_v33, %s2687_s22  ;;  %s2721_s22 = smov 17  }
  0xc7   : > { %667 = vrot.lane.b32.xlu1 %v663_v42, %s2689_s20 }
  0xc8   : > { %596 = vrot.lane.b32.xlu0 %v589_v46, %s2697_s24 }
  0xcb   : > { %665 = vrot.lane.b32.xlu1 %v662_v53, %s2689_s20  ;;  %s2716_s20 = smov 112  }
  0xcc   : > { %630 = vrot.lane.b32.xlu0 %v626_v55, %s2699_s15 }
  0xcf   : > { %632 = vrot.lane.b32.xlu1 %v627_v59, %s2699_s15 }
  0xd0   : > { %594 = vrot.lane.b32.xlu0 %v588_v63, %s2697_s24  ;;  %s2714_s24 = smov 111  }
  0xd3   : > { %628 = vrot.lane.b32.xlu1 %v625_v0, %s2699_s15 }
  0xd4   : > { %777 = vperm.xlu0 %1800, %v774_v1  }
  0xd7   : > { %845 = vperm.xlu1 %1831, %v842_v4  }
  0xd8   : > { %853 = vperm.xlu0 %1800, %v850_v37  }
  0xdb   : > { %1024 = vrot.lane.b32.xlu1 %v2196_v5, %s2714_s24 }
  0xdc   : > { %935 = vrot.lane.b32.xlu0 %v2086_v43, %s2699_s15 }
  0xdf   : > { %985 = vrot.lane.b32.xlu1 %v2203_v6, %s2715_s23 }
  0xe3   : > { %1003 = vrot.lane.b32.xlu1 %v1901_v3, %s2716_s20 }
  0xe7   : > { %964 = vrot.lane.b32.xlu1 %v2210_v7, %s2717_s16 }
  0xeb   : > { %914 = vrot.lane.b32.xlu1 %v2215_v8, %s2718_s21 }
 0x11a   : > { %v540_v12 = vpop.permute.xlu0 %539 }
 0x11d   : > { %v748_v13 = vpop.permute.xlu1 %747 }
 0x11e   : > { %v750_v14 = vpop.permute.xlu0 %749 }
 0x11f   : > { %v752_v15 = vsel %vm528_vm9, %v748_v13, %v750_v14 }
 0x120   : > { %756 = vst [vmem:[#allocation3 + $0x88] sm:$0xf] %v752_v15 }
 0x121   : > { %v697_v17 = vpop.permute.xlu1 %696 }
 0x122   : > { %v699_v18 = vpop.permute.xlu0 %698 }
 0x123   : > { %v701_v19 = vsel %vm583_vm11, %v697_v17, %v699_v18 }
 0x124   : > { %705 = vst [vmem:[#allocation3 + $0x38] sm:$0xf] %v701_v19 }
 0x125   : > { %v718_v20 = vpop.permute.xlu1 %717 }
 0x126   : > { %v723_v23 = vsel %vm721_vm13, %v718_v20, %v720_v9  ;;  %v670_v24 = vpop.permute.xlu0 %669 }
 0x127   : > { %727 = vst [vmem:[#allocation3 + $0x38] sm:$0xf0] %v723_v23  ;;  %v766_v25 = vld [vmem:[#allocation3 + $0x88] sm:$0xf] }
 0x128   : > { %v772_v26 = vpack.c.bf16 %v766_v25, %v766_v25 }
 0x129   : > { %v716_v30 = vpop.permute.xlu1 %715 }
 0x12a   : > { %v722_v31 = vsel %vm721_vm13, %v716_v30, %v718_v20  ;;  %1737 = vmatprep.subr.msk.bf16.mxu1 %vm784_vm14, %v772_v26  ;;  %v746_v32 = vpop.permute.xlu0 %745 }
 0x12b   : > { %726 = vst [vmem:[#allocation3 + $0x90] sm:$0xf0] %v722_v31  ;;  %v751_v33 = vsel %vm528_vm9, %v746_v32, %v748_v13 }
 0x12c   : > { %755 = vst [vmem:[#allocation3 + $0xc8] sm:$0xf] %v751_v33 }
 0x12d   : > { %v544_v34 = vpop.permute.xlu1 %543 }
 0x12e   : > { %v695_v35 = vpop.permute.xlu0 %694  ;;  %v764_v15 = vld [vmem:[#allocation3 + $0x38] sm:$0xff] }
 0x12f   : > { %v700_v40 = vsel %vm583_vm11, %v695_v35, %v697_v17  ;;  %v773_v35 = vld [vmem:[%s2719_s3] sm:$0x3] }
 0x130   : > { %704 = vst [vmem:[#allocation3 + $0x90] sm:$0xf] %v700_v40 }
 0x131   : > { %v566_v42 = vpop.permute.xlu1 %565 }
 0x132   : > { %v542_v45 = vpop.permute.xlu0 %541 }
 0x133   : > { %v546_v46 = vsel %vm545_vm6, %v540_v12, %v542_v45  ;;  %v547_v48 = vsel %vm545_vm6, %v542_v45, %v544_v34  ;;  %v765_v52 = vld [vmem:[#allocation3 + $0xc8] sm:$0xf] }
 0x134   : > { %550 = vst [vmem:[#allocation3] sm:$0xf] %v546_v46  ;;  %551 = vst [vmem:[#allocation3 + $0x18] sm:$0xf] %v547_v48  ;;  %v771_v53 = vpack.c.bf16 %v765_v52, %v765_v52 }
 0x135   : > { %v599_v54 = vpop.permute.xlu1 %598 }
 0x136   : > { %v564_v55 = vpop.permute.xlu0 %563  ;;  %v786_v57 = vsel %vm784_vm14, %v771_v53, 0 }
 0x137   : > { %v568_v58 = vsel %vm567_vm15, %v562_v11, %v564_v55  ;;  %v569_v59 = vsel %vm567_vm15, %v564_v55, %v566_v42  ;;  %802 = vmatpush1.bf16.msra.mxu1 %v786_v57 }
 0x138   : > { %572 = vst [vmem:[#allocation3] sm:$0xf0] %v568_v58  ;;  %573 = vst [vmem:[#allocation3 + $0x18] sm:$0xf0] %v569_v59 }
 0x139   : > { %v668_v62 = vpop.permute.xlu1 %667 }
 0x13a   : > { %v672_v63 = vsel %vm614_vm12, %v668_v62, %v670_v24  ;;  %v597_v0 = vpop.permute.xlu0 %596  ;;  %v763_v24 = vld [vmem:[#allocation3 + $0x90] sm:$0xff] }
 0x13b   : > { %676 = vst [vmem:[#allocation3 + $0xd0] sm:$0xf0] %v672_v63  ;;  %v602_v1 = vsel %vm600_vm7, %v597_v0, %v599_v54 }
 0x13c   : > { %606 = vst [vmem:[#allocation3 + $0x58] sm:$0xf] %v602_v1 }
 0x13d   : > { %v666_v4 = vpop.permute.xlu1 %665 }
 0x13e   : > { %v671_v37 = vsel %vm614_vm12, %v666_v4, %v668_v62  ;;  %v631_v9 = vpop.permute.xlu0 %630 }
 0x13f   : > { %675 = vst [vmem:[#allocation3 + $0xb8] sm:$0xf0] %v671_v37  ;;  %v758_v26 = vld [vmem:[#allocation3 + $0x18] sm:$0xff]  ;;  %v757_v32 = vld [vmem:[#allocation3] sm:$0xff] }
 0x141   : > { %v633_v12 = vpop.permute.xlu1 %632 }
 0x142   : > { %v636_v11 = vsel %vm634_vm10, %v631_v9, %v633_v12  ;;  %v595_v13 = vpop.permute.xlu0 %594  ;;  %v762_v14 = vld [vmem:[#allocation3 + $0xd0] sm:$0xff] }
 0x143   : > { %640 = vst [vmem:[#allocation3 + $0x58] sm:$0xf0] %v636_v11  ;;  %v601_v17 = vsel %vm600_vm7, %v595_v13, %v597_v0  ;;  %v770_v18 = vpack.c.bf16 %v764_v15, %v762_v14 }
 0x144   : > { %605 = vst [vmem:[#allocation3 + $0x50] sm:$0xf] %v601_v17 }
 0x145   : > { %803 = vmatprep.subr.bf16.mxu1 %v770_v18  ;;  %v629_v19 = vpop.permute.xlu1 %628 }
 0x146   : > { %v635_v20 = vsel %vm634_vm10, %v629_v19, %v631_v9  ;;  %v761_v23 = vld [vmem:[#allocation3 + $0xb8] sm:$0xff] }
 0x147   : > { %639 = vst [vmem:[#allocation3 + $0x50] sm:$0xf0] %v635_v20  ;;  %v769_v25 = vpack.c.bf16 %v763_v24, %v761_v23  ;;  %v2290_v23 = vmul.f32 0.0, %v2088_v44 }
 0x149   : > { %804 = vmatpush1.bf16.msra.mxu1 %v769_v25  ;;  %v1061_v25 = vld [vmem:[%s2678_s8] sm:$0xf] }
 0x14a   : > { %v760_v30 = vld [vmem:[#allocation3 + $0x58] sm:$0xff] }
 0x14b   : > { %v768_v31 = vpack.c.bf16 %v760_v30, %v758_v26  ;;  %v1126_v30 = vld [vmem:[%s2679_s9 + $0x8] sm:$0xf] }
 0x14d   : > { %805 = vmatprep.subr.bf16.mxu1 %v768_v31 }
 0x14e   : > { %v759_v33 = vld [vmem:[#allocation3 + $0x50] sm:$0xff] }
 0x14f   : > { %v767_v34 = vpack.c.bf16 %v759_v33, %v757_v32  ;;  %v778_v40 = vpop.permute.xlu0 %777  ;;  %v1142_v32 = vld [vmem:[%s2680_s10 + $0x8] sm:$0xf]  ;;  %v1459_v33 = vld [vmem:[#allocation2 + $0x38] sm:$0xf] }
 0x151   : > { %806 = vmatpush1.bf16.msra.mxu1 %v767_v34  ;;  %v1504_v34 = vld [vmem:[#allocation2 + $0x38] sm:$0xf] }
 0x152   : > { %v846_v57 = vpop.permute.xlu1 %845 }
 0x153   : > { %v854_v62 = vpop.permute.xlu0 %853 }
 0x154   : > { %1738 = vmatmul.mubr.msk.bf16.vlgmr.msra.gmra.mxu1 %vm780_vm0, %v773_v35 }
 0x155   : > { %1110 = vmatprep.mubr.bf16.mxu1 %v1900_v2 }
 0x156   : > { %v1025_v43 = vpop.permute.xlu1 %1024 }
 0x214   : > { %v825_v42 = vpop.f32.mrf.mxu1 }
 0x215   : > { %v826_v45 = vadd.f32 %v825_v42, %v778_v40  ;;  %v1473_v42 = vrot.slane %v1459_v33, 4 }
 0x216   : > { %v827_v46 = vpop.f32.mrf.mxu1 }
 0x217   : > { %v834_v48 = vrot.slane %v826_v45, 4  ;;  %v828_v52 = vadd.f32 %v827_v46, %v778_v40  ;;  %v2315_v40 = vrot.slane %v1901_v3, 4  ;;  %v1510_v45 = vmul.f32 %v2081_v38, %v1504_v34  ;;  %v1417_v46 = vld [vmem:[#allocation2 + $0x38] sm:$0xf] }
 0x218   : > { %v829_v53 = vpop.f32.mrf.mxu1 }
 0x219   : > { %838 = vst [vmem:[%s2062_s1] sm:$0xf0] %v834_v48  ;;  %v835_v54 = vrot.slane %v828_v52, 4  ;;  %v1366_v48 = vld [vmem:[#allocation2 + $0x38] sm:$0xf]  ;;  %v1474_v52 = vsel %vm1071_vm8, %v2315_v40, %v1473_v42  ;;  %v1423_v53 = vmul.f32 %v2098_v50, %v1417_v46 }
 0x21a   : > { %v830_v55 = vpop.f32.mrf.mxu1  ;;  %v1832_v38 = vpack.i.bf16 %v1474_v52, %v2315_v40 }
 0x21b   : > { %839 = vst [vmem:[%s2062_s1 + $0x8] sm:$0xf0] %v835_v54  ;;  %v1125_v54 = vld [vmem:[%s2679_s9] sm:$0xff]  ;;  %v1372_v55 = vmul.f32 %v2105_v56, %v1366_v48  ;;  %v1218_v56 = vld [vmem:[#allocation2 + $0x8] sm:$0xf] }
 0x220   : > { %v2244_v58 = vld [vmem:[%s2062_s1] sm:$0xff] }
 0x221   : > { %v848_v59 = vmul.f32 %v846_v57, %v2244_v58 }
 0x222   : > { %v2248_v63 = vld [vmem:[%s2062_s1 + $0x8] sm:$0xff] }
 0x223   : > { %v856_v2 = vadd.f32 %v854_v62, %v848_v59  ;;  %v849_v0 = vmul.f32 %v846_v57, %v2248_v63  ;;  %v1141_v57 = vld [vmem:[%s2680_s10] sm:$0xff]  ;;  %v1381_v59 = vrot.slane %v2210_v7, 4  ;;  %v1263_v7 = vld [vmem:[#allocation2 + $0x8] sm:$0xf] }
 0x225   : > { %vm858_vm1 = vcmp.ge.f32.partialorder %v856_v2, 0.0  ;;  %v860_v1 = vmul.f32 0.2, %v856_v2  ;;  %v857_v4 = vadd.f32 %v854_v62, %v849_v0  ;;  %v1230_v62 = vrot.slane %v1218_v56, 4 }
 0x226   : > { %v1269_v0 = vmul.f32 %v2155_v29, %v1263_v7 }
 0x227   : > { %v2251_v37 = vsel %vm858_vm1, %v856_v2, %v860_v1  ;;  %vm859_vm2 = vcmp.ge.f32.partialorder %v857_v4, 0.0  ;;  %v861_v9 = vmul.f32 0.2, %v857_v4  ;;  %v1231_v2 = vsel %vm1071_vm8, %v2315_v40, %v1230_v62  ;;  %v936_v1 = vpop.permute.xlu0 %935 }
 0x228   : > { %999 = vrot.lane.b32.xlu1 %v2251_v37, %s2716_s20  ;;  %949 = vst [vmem:[#allocation3 + $0xc8] sm:$0xff] %v2251_v37  ;;  %v1014_v11 = vmul.f32 %v2083_v39, %v2251_v37  ;;  %v975_v13 = vmul.f32 %v2100_v51, %v2251_v37  ;;  %v954_v14 = vmul.f32 %v2134_v16, %v2251_v37 }
 0x229   : > { %v2256_v12 = vsel %vm859_vm2, %v857_v4, %v861_v9  ;;  %v909_v15 = vmul.f32 %v2251_v37, %v2165_v36  ;;  %v930_v17 = vmul.f32 %v2251_v37, %v2170_v41  ;;  %v870_v19 = vmul.f32 %v2251_v37, %v2141_v21 }
 0x22a   : > { %1001 = vrot.lane.b32.xlu0 %v2256_v12, %s2716_s20  ;;  %950 = vst [vmem:[#allocation3 + $0x88] sm:$0xff] %v2256_v12  ;;  %v1015_v18 = vmul.f32 %v2256_v12, %v2095_v47  ;;  %v976_v20 = vmul.f32 %v2256_v12, %v2118_v61  ;;  %v955_v24 = vmul.f32 %v2256_v12, %v2150_v27 }
 0x22b   : > { %v910_v26 = vmul.f32 %v2144_v22, %v2256_v12  ;;  %v931_v31 = vmul.f32 %v2153_v28, %v2256_v12  ;;  %v871_v35 = vmul.f32 %v2127_v10, %v2256_v12 }
 0x22c   : > { %1020 = vrot.lane.b32.xlu1 %v1014_v11, %s2714_s24 }
 0x22e   : > { %981 = vrot.lane.b32.xlu0 %v975_v13, %s2715_s23 }
 0x230   : > { %895 = vrot.lane.b32.xlu1 %v2251_v37, %s2720_s30 }
 0x232   : > { %960 = vrot.lane.b32.xlu0 %v954_v14, %s2717_s16 }
 0x234   : > { %916 = vrot.lane.b32.xlu1 %v909_v15, %s2718_s21 }
 0x236   : > { %897 = vrot.lane.b32.xlu0 %v2256_v12, %s2720_s30 }
 0x238   : > { %937 = vrot.lane.b32.xlu1 %v930_v17, %s2699_s15 }
 0x23a   : > { %1022 = vrot.lane.b32.xlu0 %v1015_v18, %s2714_s24 }
 0x23c   : > { %877 = vrot.lane.b32.xlu1 %v870_v19, %s2721_s22 }
 0x23e   : > { %983 = vrot.lane.b32.xlu0 %v976_v20, %s2715_s23 }
 0x240   : > { %875 = vrot.lane.b32.xlu1 %v2290_v23, %s2721_s22 }
 0x242   : > { %962 = vrot.lane.b32.xlu0 %v955_v24, %s2717_s16 }
 0x244   : > { %1064 = vperm.xlu1 %1831, %v1061_v25  }
 0x246   : > { %918 = vrot.lane.b32.xlu0 %v910_v26, %s2718_s21 }
 0x248   : > { %1134 = vperm.xlu1 %1831, %v1126_v30  }
 0x24a   : > { %939 = vrot.lane.b32.xlu0 %v931_v31, %s2722_s0 }
 0x24c   : > { %1150 = vperm.xlu1 %1831, %v1142_v32  }
 0x24e   : > { %879 = vrot.lane.b32.xlu0 %v871_v35, %s2721_s22 }
 0x250   : > { %1527 = vrot.lane.b32.xlu1 %v1510_v45, %s2714_s24 }
 0x252   : > { %893 = vrot.lane.b32.xlu0 %v1901_v3, %s2720_s30  ;;  %v1386_v3 = vrot.slane %v1372_v55, 4 }
 0x254   : > { %1440 = vrot.lane.b32.xlu1 %v1423_v53, %s2715_s23  ;;  %v1387_v50 = vsel %vm1071_vm8, %v1381_v59, %v1386_v3 }
 0x256   : > { %1129 = vperm.xlu0 %1800, %v1125_v54  }
 0x258   : > { %1833 = vrot.lane.b32.xlu1 %v1832_v38, %s2716_s20 }
 0x25a   : > { %1145 = vperm.xlu0 %1800, %v1141_v57  }
 0x25c   : > { %1398 = vrot.lane.b32.xlu1 %v1387_v50, %s2717_s16 }
 0x25e   : > { %1521 = vrot.lane.b32.xlu0 %v2196_v5, %s2714_s24 }
 0x260   : > { %1434 = vrot.lane.b32.xlu1 %v2203_v6, %s2715_s23 }
 0x262   : > { %1329 = vrot.lane.b32.xlu0 %v1320_v49, %s2722_s0  ;;  %v986_v49 = vpop.permute.xlu1 %985 }
 0x264   : > { %1392 = vrot.lane.b32.xlu1 %v1381_v59, %s2717_s16 }
 0x266   : > { %1242 = vrot.lane.b32.xlu0 %v1231_v2, %s2720_s30  ;;  %v1004_v5 = vpop.permute.xlu1 %1003 }
 0x268   : > { %1284 = vrot.lane.b32.xlu1 %v1269_v0, %s2718_s21 }
 0x26a   : > { %v965_v6 = vpop.permute.xlu1 %964 }
 0x26c   : > { %1335 = vrot.lane.b32.xlu1 %v2112_v60, %s2722_s0 }
 0x26e   : > { %v915_v4 = vpop.permute.xlu1 %914 }
 0x270   : > { %1278 = vrot.lane.b32.xlu1 %v2215_v8, %s2718_s21 }
 0x29a   : > { %v1000_v9 = vpop.permute.xlu1 %999 }
 0x29c   : > { %v1002_v11 = vpop.permute.xlu0 %1001 }
 0x29d   : > { %v1005_v29 = vsel %vm721_vm13, %v1000_v9, %v1002_v11  ;;  %v1006_v13 = vsel %vm721_vm13, %v1002_v11, %v1004_v5 }
 0x29e   : > { %1009 = vst [vmem:[#allocation3 + $0xa0] sm:$0xff] %v1005_v29  ;;  %1010 = vst [vmem:[#allocation3 + $0x20] sm:$0xff] %v1006_v13  ;;  %v1021_v15 = vpop.permute.xlu1 %1020 }
 0x2a0   : > { %v982_v14 = vpop.permute.xlu0 %981 }
 0x2a2   : > { %v896_v17 = vpop.permute.xlu1 %895 }
 0x2a4   : > { %v961_v60 = vpop.permute.xlu0 %960 }
 0x2a6   : > { %v917_v30 = vpop.permute.xlu1 %916 }
 0x2a7   : > { %v920_v56 = vsel %vm600_vm7, %v915_v4, %v917_v30 }
 0x2a8   : > { %v898_v18 = vpop.permute.xlu0 %897 }
 0x2a9   : > { %v900_v8 = vsel %vm567_vm15, %v896_v17, %v898_v18 }
 0x2aa   : > { %904 = vst [vmem:[#allocation3 + $0x58] sm:$0xff] %v900_v8  ;;  %v938_v52 = vpop.permute.xlu1 %937 }
 0x2ab   : > { %v941_v38 = vsel %vm634_vm10, %v936_v1, %v938_v52  ;;  %v1060_v1 = vld [vmem:[%s2677_s7] sm:$0x3] }
 0x2ac   : > { %v1023_v19 = vpop.permute.xlu0 %1022  ;;  %v1052_v7 = vpack.c.bf16 %v941_v38, %v920_v56 }
 0x2ad   : > { %v1026_v20 = vsel %vm528_vm9, %v1021_v15, %v1023_v19  ;;  %v1027_v24 = vsel %vm528_vm9, %v1023_v19, %v1025_v43 }
 0x2ae   : > { %v1059_v25 = vpack.c.bf16 %v1027_v24, %v1027_v24  ;;  %v1058_v26 = vpack.c.bf16 %v1026_v20, %v1026_v20  ;;  %v878_v57 = vpop.permute.xlu1 %877 }
 0x2b0   : > { %v984_v31 = vpop.permute.xlu0 %983  ;;  %1739 = vmatprep.subr.msk.bf16.mxu1 %vm1071_vm8, %v1059_v25  ;;  %v1073_v32 = vsel %vm1071_vm8, %v1058_v26, 0 }
 0x2b1   : > { %v987_v33 = vsel %vm583_vm11, %v982_v14, %v984_v31  ;;  %v988_v34 = vsel %vm583_vm11, %v984_v31, %v986_v49  ;;  %1085 = vmatpush1.bf16.msra.mxu1 %v1073_v32 }
 0x2b2   : > { %v1057_v35 = vpack.c.bf16 %v1006_v13, %v988_v34  ;;  %v1056_v42 = vpack.c.bf16 %v1005_v29, %v987_v33 }
 0x2b4   : > { %v963_v45 = vpop.permute.xlu0 %962  ;;  %1086 = vmatprep.subr.bf16.mxu1 %v1057_v35 }
 0x2b5   : > { %v966_v46 = vsel %vm614_vm12, %v961_v60, %v963_v45  ;;  %v967_v48 = vsel %vm614_vm12, %v963_v45, %v965_v6  ;;  %1087 = vmatpush1.bf16.msra.mxu1 %v1056_v42 }
 0x2b6   : > { %v1055_v53 = vpack.c.bf16 %v967_v48, %v2256_v12  ;;  %v1054_v54 = vpack.c.bf16 %v966_v46, %v2251_v37  ;;  %v876_v37 = vpop.permute.xlu1 %875 }
 0x2b7   : > { %v881_v49 = vsel %vm545_vm6, %v876_v37, %v878_v57 }
 0x2b8   : > { %v919_v55 = vpop.permute.xlu0 %918  ;;  %1088 = vmatprep.subr.bf16.mxu1 %v1055_v53 }
 0x2b9   : > { %1089 = vmatpush1.bf16.msra.mxu1 %v1054_v54  ;;  %v921_v3 = vsel %vm600_vm7, %v917_v30, %v919_v55 }
 0x2bc   : > { %v940_v59 = vpop.permute.xlu0 %939 }
 0x2bd   : > { %v942_v50 = vsel %vm634_vm10, %v938_v52, %v940_v59 }
 0x2be   : > { %v1053_v62 = vpack.c.bf16 %v942_v50, %v921_v3 }
 0x2bf   : > { %v1065_v52 = vpop.permute.xlu1 %1064 }
 0x2c0   : > { %v880_v2 = vpop.permute.xlu0 %879  ;;  %1090 = vmatprep.subr.bf16.mxu1 %v1053_v62 }
 0x2c1   : > { %v882_v12 = vsel %vm545_vm6, %v878_v57, %v880_v2  ;;  %1091 = vmatpush1.bf16.msra.mxu1 %v1052_v7 }
 0x2c2   : > { %v1051_v0 = vpack.c.bf16 %v900_v8, %v882_v12 }
 0x2c3   : > { %v2452_v53 = vpop.permute.xlu1 %1134 }
 0x2c4   : > { %v894_v43 = vpop.permute.xlu0 %893  ;;  %1092 = vmatprep.subr.bf16.mxu1 %v1051_v0 }
 0x2c5   : > { %v899_v5 = vsel %vm567_vm15, %v894_v43, %v896_v17 }
 0x2c6   : > { %903 = vst [vmem:[#allocation3 + $0x50] sm:$0xff] %v899_v5  ;;  %v1050_v6 = vpack.c.bf16 %v899_v5, %v881_v49 }
 0x2c7   : > { %v2454_v54 = vpop.permute.xlu1 %1150 }
 0x2c8   : > { %1093 = vmatpush1.bf16.msra.mxu1 %v1050_v6 }
 0x2cb   : > { %1740 = vmatmul.mubr.msk.bf16.vlgmr.msra.gmra.mxu1 %vm1067_vm3, %v1060_v1  ;;  %v2456_v55 = vpop.permute.xlu1 %1527 }
 0x2cf   : > { %v2458_v38 = vpop.permute.xlu1 %1440 }
 0x2d1   : > { %v1130_v4 = vpop.permute.xlu0 %1129 }
 0x2d2   : > { %v1137_v9 = vmul.f32 %v1130_v4, %v2244_v58  ;;  %v1138_v11 = vmul.f32 %v1130_v4, %v2248_v63 }
 0x2d3   : > { %v2460_v57 = vpop.permute.xlu1 %1833 }
 0x2d5   : > { %v1146_v29 = vpop.permute.xlu0 %1145 }
 0x2d6   : > { %v1153_v13 = vadd.f32 %v1146_v29, %v1137_v9  ;;  %v1154_v14 = vadd.f32 %v1146_v29, %v1138_v11 }
 0x2d7   : > { %v2462_v59 = vpop.permute.xlu1 %1398 }
 0x2d8   : > { %vm1157_vm4 = vcmp.ge.f32.partialorder %v1153_v13, 0.0  ;;  %vm1158_vm5 = vcmp.ge.f32.partialorder %v1154_v14, 0.0  ;;  %v1161_v15 = vmul.f32 0.2, %v1153_v13  ;;  %v1162_v60 = vmul.f32 0.2, %v1154_v14 }
 0x2d9   : > { %v1522_v56 = vpop.permute.xlu0 %1521 }
 0x2da   : > { %v2380_v17 = vsel %vm1157_vm4, %v1153_v13, %v1161_v15  ;;  %v2382_v18 = vsel %vm1158_vm5, %v1154_v14, %v1162_v60  ;;  %v1835_v15 = vunpack.i.l.bf16 %v2460_v57 }
 0x2db   : > { %1169 = vst [vmem:[#allocation2] sm:$0xff] %v2380_v17  ;;  %1170 = vst [vmem:[#allocation2 + $0x18] sm:$0xff] %v2382_v18  ;;  %v1505_v58 = vmul.f32 %v2083_v39, %v2380_v17  ;;  %v1418_v63 = vmul.f32 %v2100_v51, %v2380_v17  ;;  %v2393_v8 = vrot.slane %v2380_v17, 4  ;;  %v1506_v19 = vmul.f32 %v2382_v18, %v2095_v47  ;;  %v1435_v3 = vpop.permute.xlu1 %1434 }
 0x2dc   : > { %v2399_v20 = vmul.f32 %v2380_v17, %v2170_v41  ;;  %v1267_v25 = vmul.f32 %v2380_v17, %v2165_v36  ;;  %v1268_v26 = vmul.f32 %v2144_v22, %v2382_v18  ;;  %v1180_v30 = vmul.f32 %v2380_v17, %v2141_v21 }
 0x2dd   : > { %1517 = vrot.lane.b32.xlu0 %v1505_v58, %s2714_s24  ;;  %1430 = vrot.lane.b32.xlu1 %v1418_v63, %s2715_s23  ;;  %v1181_v31 = vmul.f32 %v2127_v10, %v2382_v18  ;;  %v2420_v32 = vrot.slane %v2382_v18, 4  ;;  %v1419_v33 = vmul.f32 %v2382_v18, %v2118_v61  ;;  %v2429_v34 = vmul.f32 %v2134_v16, %v2380_v17  ;;  %v1330_v7 = vpop.permute.xlu0 %1329 }
 0x2de   : > { %v1321_v24 = vrot.slane %v2399_v20, 4  ;;  %v2435_v42 = vmul.f32 %v2382_v18, %v2150_v27  ;;  %v2443_v46 = vmul.f32 %v2153_v28, %v2382_v18 }
 0x2df   : > { %v1379_v35 = vrot.slane %v2429_v34, 4  ;;  %v1393_v50 = vpop.permute.xlu1 %1392 }
 0x2e0   : > { %v1380_v45 = vrot.slane %v2435_v42, 4  ;;  %v1322_v48 = vrot.slane %v2443_v46, 4 }
 0x2e1   : > { %1475 = vrot.lane.b32.xlu0 %v2393_v8, %s2716_s20  ;;  %1519 = vrot.lane.b32.xlu1 %v1506_v19, %s2714_s24  ;;  %v2468_v12 = vpop.permute.xlu0 %1242 }
 0x2e3   : > { %v2464_v62 = vpop.permute.xlu1 %1284 }
 0x2e5   : > { %1331 = vrot.lane.b32.xlu1 %v1321_v24, %s2722_s0  ;;  %1280 = vrot.lane.b32.xlu0 %v1267_v25, %s2718_s21 }
 0x2e7   : > { %v2466_v2 = vpop.permute.xlu1 %1335 }
 0x2e9   : > { %1282 = vrot.lane.b32.xlu1 %v1268_v26, %s2718_s21  ;;  %1193 = vrot.lane.b32.xlu0 %v1180_v30, %s2721_s22 }
 0x2eb   : > { %v1279_v37 = vpop.permute.xlu1 %1278 }
 0x2ed   : > { %1195 = vrot.lane.b32.xlu1 %v1181_v31, %s2721_s22  ;;  %1477 = vrot.lane.b32.xlu0 %v2420_v32, %s2716_s20 }
 0x2f1   : > { %1432 = vrot.lane.b32.xlu0 %v1419_v33, %s2715_s23 }
 0x2f5   : > { %1388 = vrot.lane.b32.xlu0 %v1379_v35, %s2717_s16 }
 0x2f9   : > { %1390 = vrot.lane.b32.xlu0 %v1380_v45, %s2717_s16 }
 0x2fd   : > { %1333 = vrot.lane.b32.xlu0 %v1322_v48, %s2722_s0 }
 0x34f   : > { %v1431_v0 = vpop.permute.xlu1 %1430  ;;  %v1518_v43 = vpop.permute.xlu0 %1517 }
 0x353   : > { %v1520_v49 = vpop.permute.xlu1 %1519  ;;  %v1476_v5 = vpop.permute.xlu0 %1475 }
 0x354   : > { %v2471_v6 = vsel %vm528_vm9, %v1518_v43, %v1520_v49  ;;  %v2474_v1 = vsel %vm528_vm9, %v1520_v49, %v1522_v56 }
 0x357   : > { %v1332_v4 = vpop.permute.xlu1 %1331  ;;  %v1281_v9 = vpop.permute.xlu0 %1280 }
 0x358   : > { %v1341_v11 = vsel %vm634_vm10, %v1330_v7, %v1332_v4  ;;  %v2478_v29 = vsel %vm600_vm7, %v1279_v37, %v1281_v9 }
 0x359   : > { %1349 = vst [vmem:[#allocation3 + $0xc8] sm:$0xf0] %v1341_v11  ;;  %1298 = vst [vmem:[#allocation3 + $0x90] sm:$0xff] %v2478_v29 }
 0x35b   : > { %v1283_v13 = vpop.permute.xlu1 %1282  ;;  %v2481_v14 = vpop.permute.xlu0 %1193 }
 0x35c   : > { %v2485_v60 = vsel %vm600_vm7, %v1281_v9, %v1283_v13 }
 0x35d   : > { %1299 = vst [vmem:[#allocation3 + $0x38] sm:$0xff] %v2485_v60 }
 0x35f   : > { %v1196_v58 = vpop.permute.xlu1 %1195  ;;  %v1478_v63 = vpop.permute.xlu0 %1477 }
 0x360   : > { %v2490_v19 = vsel %vm545_vm6, %v2481_v14, %v1196_v58  ;;  %v1487_v25 = vsel %vm721_vm13, %v1476_v5, %v1478_v63  ;;  %v1488_v26 = vsel %vm721_vm13, %v1478_v63, %v1835_v15 }
 0x361   : > { %1212 = vst [vmem:[#allocation3 + $0x18] sm:$0xff] %v2490_v19  ;;  %1495 = vst [vmem:[#allocation3 + $0xd8] sm:$0xf0] %v1487_v25 }
 0x362   : > { %1496 = vst [vmem:[#allocation3 + $0xb0] sm:$0xf0] %v1488_v26 }
 0x363   : > { %v1433_v30 = vpop.permute.xlu0 %1432 }
 0x364   : > { %v2496_v31 = vsel %vm583_vm11, %v1431_v0, %v1433_v30  ;;  %v2499_v33 = vsel %vm583_vm11, %v1433_v30, %v1435_v3 }
 0x367   : > { %v1389_v56 = vpop.permute.xlu0 %1388 }
 0x36b   : > { %v1391_v7 = vpop.permute.xlu0 %1390 }
 0x36c   : > { %v1400_v37 = vsel %vm614_vm12, %v1389_v56, %v1391_v7  ;;  %v1401_v43 = vsel %vm614_vm12, %v1391_v7, %v1393_v50 }
 0x36d   : > { %1408 = vst [vmem:[#allocation3 + $0xa0] sm:$0xf0] %v1400_v37  ;;  %1409 = vst [vmem:[#allocation3 + $0x20] sm:$0xf0] %v1401_v43 }
 0x36f   : > { %v1334_v49 = vpop.permute.xlu0 %1333 }
 0x370   : > { %v1342_v5 = vsel %vm634_vm10, %v1332_v4, %v1334_v49 }
 0x371   : > { %1350 = vst [vmem:[#allocation3 + $0x88] sm:$0xf0] %v1342_v5 }
 0x38b   : > { %v1112_v0 = vpop.f32.mrf.mxu1 }
 0x38c   : > { %v1113_v9 = vadd.f32 %v1112_v0, %v1065_v52 }
 0x38d   : > { %v1114_v11 = vpop.f32.mrf.mxu1 }
 0x38e   : > { %1119 = vst [vmem:[%s2062_s1 + $0x10] sm:$0xf] %v1113_v9  ;;  %v1115_v3 = vadd.f32 %v1114_v11, %v1065_v52 }
 0x38f   : > { %v1116_v13 = vpop.f32.mrf.mxu1 }
 0x390   : > { %1120 = vst [vmem:[%s2062_s1 + $0x18] sm:$0xf] %v1115_v3 }
 0x391   : > { %v1117_v15 = vpop.f32.mrf.mxu1 }
 0x395   : > { %v1123_v58 = vld [vmem:[%s2062_s1 + $0x10] sm:$0xf] }
 0x396   : > { %v1139_v63 = vmul.f32 %v2452_v53, %v1123_v58 }
 0x397   : > { %v1124_v25 = vld [vmem:[%s2062_s1 + $0x18] sm:$0xf] }
 0x398   : > { %v1155_v50 = vadd.f32 %v2454_v54, %v1139_v63  ;;  %v1140_v26 = vmul.f32 %v2452_v53, %v1124_v25 }
 0x39a   : > { %v1163_v30 = vmul.f32 0.2, %v1155_v50  ;;  %v1156_v4 = vadd.f32 %v2454_v54, %v1140_v26  ;;  %vm1159_vm14 = vcmp.ge.f32.partialorder %v1155_v50, 0.0 }
 0x39c   : > { %v1164_v56 = vmul.f32 0.2, %v1156_v4  ;;  %v1167_v7 = vsel %vm1159_vm14, %v1155_v50, %v1163_v30  ;;  %vm1160_vm0 = vcmp.ge.f32.partialorder %v1156_v4, 0.0 }
 0x39d   : > { %1171 = vst [vmem:[#allocation2 + $0x20] sm:$0xf] %v1167_v7 }
 0x39e   : > { %v1168_v52 = vsel %vm1160_vm0, %v1156_v4, %v1164_v56 }
 0x39f   : > { %1172 = vst [vmem:[#allocation2 + $0x28] sm:$0xf] %v1168_v52 }
 0x3a4   : > { %v1502_v37 = vld [vmem:[#allocation2 + $0x20] sm:$0xf] }
 0x3a5   : > { %v1219_v43 = vld [vmem:[#allocation2 + $0x20] sm:$0xf]  ;;  %v1508_v49 = vmul.f32 %v2083_v39, %v1502_v37 }
 0x3a6   : > { %v1232_v5 = vrot.slane %v1219_v43, 4  ;;  %v1415_v0 = vld [vmem:[#allocation2 + $0x20] sm:$0xf]  ;;  %v1503_v9 = vld [vmem:[#allocation2 + $0x28] sm:$0xf] }
 0x3a7   : > { %1523 = vrot.lane.b32.xlu1 %v1508_v49, %s2714_s24  ;;  %v1421_v54 = vmul.f32 %v2100_v51, %v1415_v0  ;;  %v1509_v11 = vmul.f32 %v1503_v9, %v2095_v47  ;;  %v1264_v3 = vld [vmem:[#allocation2 + $0x20] sm:$0xf]  ;;  %v1416_v13 = vld [vmem:[#allocation2 + $0x28] sm:$0xf] }
 0x3a8   : > { %v1233_v53 = vsel %vm1071_vm8, %v2393_v8, %v1232_v5  ;;  %v1457_v15 = vld [vmem:[#allocation2 + $0x20] sm:$0xf]  ;;  %v1356_v58 = vld [vmem:[#allocation2 + $0x28] sm:$0xf]  ;;  %v1270_v25 = vmul.f32 %v1264_v3, %v2165_v36  ;;  %v1422_v50 = vmul.f32 %v1416_v13, %v2118_v61 }
 0x3a9   : > { %1244 = vrot.lane.b32.xlu0 %v1233_v53, %s2720_s30  ;;  %v1306_v39 = vld [vmem:[#allocation2 + $0x20] sm:$0xf]  ;;  %1360 = vst [vmem:[#allocation3 + $0x20] sm:$0xf] %v1356_v58  ;;  %v1469_v26 = vrot.slane %v1457_v15, 4 }
 0x3aa   : > { %v1355_v63 = vld [vmem:[#allocation2 + $0x20] sm:$0xf]  ;;  %v1312_v51 = vmul.f32 %v1306_v39, %v2170_v41  ;;  %v1265_v47 = vld [vmem:[#allocation2 + $0x28] sm:$0xf] }
 0x3ab   : > { %1436 = vrot.lane.b32.xlu1 %v1421_v54, %s2715_s23  ;;  %1359 = vst [vmem:[#allocation3 + $0xa0] sm:$0xf] %v1355_v63  ;;  %v1458_v30 = vld [vmem:[#allocation2 + $0x28] sm:$0xf]  ;;  %v1364_v4 = vld [vmem:[#allocation2 + $0x20] sm:$0xf]  ;;  %v1470_v56 = vsel %vm1071_vm8, %v2393_v8, %v1469_v26  ;;  %v1271_v7 = vmul.f32 %v2144_v22, %v1265_v47 }
 0x3ac   : > { %v1325_v52 = vrot.slane %v1312_v51, 4  ;;  %v1471_v36 = vrot.slane %v1458_v30, 4  ;;  %v1220_v61 = vld [vmem:[#allocation2 + $0x28] sm:$0xf]  ;;  %v1370_v37 = vmul.f32 %v2134_v16, %v1364_v4  ;;  %v1836_v51 = vunpack.i.h.bf16 %v2460_v57 }
 0x3ad   : > { %1525 = vrot.lane.b32.xlu0 %v1509_v11, %s2714_s24  ;;  %v1365_v41 = vld [vmem:[#allocation2 + $0x28] sm:$0xf]  ;;  %v1234_v49 = vrot.slane %v1220_v61, 4  ;;  %v1177_v11 = vld [vmem:[#allocation2 + $0x20] sm:$0xf]  ;;  %s1842_s24 = sshll.u32 %s1910_s2, 4  ;;  %s1843_s24 = int_to_ptr.vmem [resolvable:$false] %s1842_s24 }
 0x3ae   : > { %v1326_v43 = vsel %vm1071_vm8, %v1321_v24, %v1325_v52  ;;  %v1472_v22 = vsel %vm1071_vm8, %v2420_v32, %v1471_v36  ;;  %v1382_v5 = vrot.slane %v1370_v37, 4  ;;  %v1371_v0 = vmul.f32 %v1365_v41, %v2150_v27  ;;  %v1178_v53 = vld [vmem:[#allocation2 + $0x28] sm:$0xf] }
 0x3af   : > { %1286 = vrot.lane.b32.xlu1 %v1270_v25, %s2718_s21  ;;  %v1235_v16 = vsel %vm1071_vm8, %v2420_v32, %v1234_v49  ;;  %v1307_v9 = vld [vmem:[#allocation2 + $0x28] sm:$0xf]  ;;  %v1184_v54 = vmul.f32 %v2127_v10, %v1178_v53  ;;  %v1183_v34 = vmul.f32 %v1177_v11, %v2141_v21  ;;  %v1584_v21 = vld [vmem:[%s2682_s12] sm:$0xf] }
 0x3b0   : > { %v1383_v20 = vsel %vm1071_vm8, %v1379_v35, %v1382_v5  ;;  %v1384_v24 = vrot.slane %v1371_v0, 4  ;;  %v1313_v3 = vmul.f32 %v2153_v28, %v1307_v9  ;;  %v1176_v35 = vld [vmem:[#allocation2 + $0x8] sm:$0xf] }
 0x3b1   : > { %1438 = vrot.lane.b32.xlu0 %v1422_v50, %s2715_s23  ;;  %v1182_v10 = vmul.f32 %v2088_v44, %v1176_v35  ;;  %s1844_s23 = scalar_lea.vmem %s1843_s24, 1024 }
 0x3b2   : > { %v1385_v27 = vsel %vm1071_vm8, %v1380_v45, %v1384_v24  ;;  %v1327_v13 = vrot.slane %v1313_v3, 4  ;;  %v1555_v24 = vld [vmem:[#allocation3 + $0xa0] sm:$0xff] }
 0x3b3   : > { %1481 = vrot.lane.b32.xlu1 %v1470_v56, %s2716_s20 }
 0x3b4   : > { %v1328_v42 = vsel %vm1071_vm8, %v1322_v48, %v1327_v13  ;;  %vm1594_vm8 = vcmask 1045504  }
 0x3b5   : > { %1288 = vrot.lane.b32.xlu0 %v1271_v7, %s2718_s21  ;;  %s1749_s21 = sshll.u32 %s2003_s29, 9  ;;  %s2723_s29 = sand.u32 1, %s1890_s26  }
 0x3b6   : > { %s2621_s4 = scalar_lea.hbm %s2683_s13, %s1749_s21  ;;  %s2629_s5 = scalar_lea.sflag [#allocation5], %s2723_s29 }
 0x3b7   : > { %1337 = vrot.lane.b32.xlu1 %v1326_v43, %s2722_s0 }
 0x3b9   : > { %1483 = vrot.lane.b32.xlu0 %v1472_v22, %s2716_s20  ;;  %v1556_v22 = vld [vmem:[#allocation3 + $0x20] sm:$0xff] }
 0x3bb   : > { %1246 = vrot.lane.b32.xlu1 %v1235_v16, %s2720_s30 }
 0x3bd   : > { %1394 = vrot.lane.b32.xlu0 %v1383_v20, %s2717_s16  ;;  %v1576_v20 = vpack.c.bf16 %v1556_v22, %v2382_v18 }
 0x3bf   : > { %1201 = vrot.lane.b32.xlu1 %v1184_v54, %s2721_s22 }
 0x3c1   : > { %1396 = vrot.lane.b32.xlu0 %v1385_v27, %s2717_s16  ;;  %v1575_v27 = vpack.c.bf16 %v1555_v24, %v2380_v17 }
 0x3c3   : > { %1240 = vrot.lane.b32.xlu1 %v2420_v32, %s2720_s30 }
 0x3c5   : > { %1199 = vrot.lane.b32.xlu0 %v1183_v34, %s2721_s22 }
 0x3c7   : > { %1197 = vrot.lane.b32.xlu1 %v1182_v10, %s2721_s22 }
 0x3c9   : > { %1339 = vrot.lane.b32.xlu0 %v1328_v42, %s2722_s0 }
 0x3cb   : > { %1587 = vperm.xlu1 %1831, %v1584_v21  }
 0x3cd   : > { %1238 = vrot.lane.b32.xlu0 %v2393_v8, %s2720_s30 }
 0x3d1   : > { %1191 = vrot.lane.b32.xlu0 %v2290_v23, %s2721_s22  ;;  %s1664_s22 = sshll.u32 %s2062_s1, 4  ;;  %s2624_s22 = int_to_ptr.vmem [resolvable:$true] %s1664_s22 }
 0x3d2   : > { %s1838_s15 = scalar_lea.vmem %s2624_s22, 512  ;;  %p1845_p0 = scmp.lt.s32.totalorder %s2624_s22, %s1843_s24 }
 0x3d3   : > { %p1839_p11 = scmp.ne.s32.totalorder %s2624_s22, %s1838_s15  ;;  %p1846_p1 = scmp.lt.s32.totalorder %s1844_s23, %s1838_s15 }
 0x3d5   : > { %1236 = vrot.lane.b32.xlu0 %v2315_v40, %s2720_s30  ;;  %p1840_p12 = pnand %p1839_p11, %p2020_p5  ;;  %p1847_p2 = por %p1846_p1, %p1845_p0 }
 0x3d7   : > { %p1841_p13 = pneg %p1840_p12 }
 0x3d9   : > { %p1848_p3 = pnand %p1847_p2, %p1841_p13 }
 0x419   : > { %v1524_v44 = vpop.permute.xlu1 %1523 }
 0x41b   : > { %v1245_v28 = vpop.permute.xlu0 %1244 }
 0x41c   : > { %v2575_v32 = vsel %vm567_vm15, %v2468_v12, %v1245_v28 }
 0x41d   : > { %1258 = vst [vmem:[#allocation3 + $0xb8] sm:$0xff] %v2575_v32  ;;  %v1437_v45 = vpop.permute.xlu1 %1436  ;;  %v1571_v17 = vpack.c.bf16 %v2478_v29, %v2575_v32  ;;  %v1583_v29 = vld [vmem:[%s2681_s11] sm:$0x3] }
 0x41f   : > { %v1526_v46 = vpop.permute.xlu0 %1525 }
 0x420   : > { %v1531_v48 = vsel %vm528_vm9, %v1524_v44, %v1526_v46  ;;  %v1532_v8 = vsel %vm528_vm9, %v1526_v46, %v2456_v55 }
 0x421   : > { %1539 = vst [vmem:[#allocation3 + $0x40] sm:$0xf] %v1531_v48  ;;  %1540 = vst [vmem:[#allocation3 + $0xa8] sm:$0xf] %v1532_v8  ;;  %v1287_v23 = vpop.permute.xlu1 %1286 }
 0x422   : > { %v1292_v40 = vsel %vm600_vm7, %v2464_v62, %v1287_v23 }
 0x423   : > { %v1439_v15 = vpop.permute.xlu0 %1438  ;;  %1300 = vst [vmem:[#allocation3 + $0xc8] sm:$0xf] %v1292_v40 }
 0x424   : > { %v1444_v12 = vsel %vm583_vm11, %v1437_v45, %v1439_v15  ;;  %v1445_v39 = vsel %vm583_vm11, %v1439_v15, %v2458_v38 }
 0x425   : > { %1452 = vst [vmem:[#allocation3 + $0xd8] sm:$0xf] %v1444_v12  ;;  %1453 = vst [vmem:[#allocation3 + $0xb0] sm:$0xf] %v1445_v39  ;;  %v1482_v58 = vpop.permute.xlu1 %1481 }
 0x427   : > { %v1289_v63 = vpop.permute.xlu0 %1288 }
 0x428   : > { %v1293_v25 = vsel %vm600_vm7, %v1287_v23, %v1289_v63  ;;  %v1568_v55 = vld [vmem:[#allocation3 + $0xa8] sm:$0xf]  ;;  %v1567_v50 = vld [vmem:[#allocation3 + $0x40] sm:$0xf] }
 0x429   : > { %1301 = vst [vmem:[#allocation3 + $0x88] sm:$0xf] %v1293_v25  ;;  %v1582_v26 = vpack.c.bf16 %v1568_v55, %v2474_v1  ;;  %v1581_v62 = vpack.c.bf16 %v1567_v50, %v2471_v6  ;;  %v1338_v47 = vpop.permute.xlu1 %1337 }
 0x42a   : > { %v1343_v38 = vsel %vm634_vm10, %v2466_v2, %v1338_v47 }
 0x42b   : > { %1741 = vmatprep.subr.msk.bf16.mxu0 %vm1594_vm8, %v1582_v26  ;;  %v1484_v30 = vpop.permute.xlu0 %1483  ;;  %v1596_v4 = vsel %vm1594_vm8, %v1581_v62, 0 }
 0x42c   : > { %v1489_v56 = vsel %vm721_vm13, %v1482_v58, %v1484_v30  ;;  %v1490_v7 = vsel %vm721_vm13, %v1484_v30, %v1836_v51  ;;  %1604 = vmatpush1.bf16.msra.mxu0 %v1596_v4  ;;  %v1562_v52 = vld [vmem:[#allocation3 + $0xb0] sm:$0xff]  ;;  %v1561_v36 = vld [vmem:[#allocation3 + $0xd8] sm:$0xff] }
 0x42d   : > { %v1580_v61 = vpack.c.bf16 %v1490_v7, %v1562_v52  ;;  %v1579_v1 = vpack.c.bf16 %v1489_v56, %v1561_v36  ;;  %v1247_v37 = vpop.permute.xlu1 %1246 }
 0x42e   : > { %v1251_v6 = vsel %vm567_vm15, %v1245_v28, %v1247_v37 }
 0x42f   : > { %v1395_v57 = vpop.permute.xlu0 %1394  ;;  %1605 = vmatprep.subr.bf16.mxu0 %v1580_v61  ;;  %1259 = vst [vmem:[#allocation3 + $0xd0] sm:$0xff] %v1251_v6  ;;  %v1572_v13 = vpack.c.bf16 %v2485_v60, %v1251_v6 }
 0x430   : > { %1606 = vmatpush1.bf16.msra.mxu0 %v1579_v1  ;;  %v1550_v3 = vld [vmem:[#allocation3 + $0x88] sm:$0xff] }
 0x431   : > { %v1202_v2 = vpop.permute.xlu1 %1201 }
 0x433   : > { %v1397_v41 = vpop.permute.xlu0 %1396 }
 0x434   : > { %v1402_v43 = vsel %vm614_vm12, %v1395_v57, %v1397_v41  ;;  %v1403_v49 = vsel %vm614_vm12, %v1397_v41, %v2462_v59 }
 0x435   : > { %v1578_v5 = vpack.c.bf16 %v2499_v33, %v1403_v49  ;;  %v1577_v0 = vpack.c.bf16 %v2496_v31, %v1402_v43  ;;  %v1241_v16 = vpop.permute.xlu1 %1240  ;;  %v1549_v33 = vld [vmem:[#allocation3 + $0xc8] sm:$0xff] }
 0x436   : > { %v1573_v18 = vpack.c.bf16 %v1343_v38, %v1549_v33 }
 0x437   : > { %v1200_v53 = vpop.permute.xlu0 %1199  ;;  %1607 = vmatprep.subr.bf16.mxu0 %v1578_v5 }
 0x438   : > { %v1206_v9 = vsel %vm545_vm6, %v1200_v53, %v1202_v2  ;;  %1608 = vmatpush1.bf16.msra.mxu0 %v1577_v0 }
 0x439   : > { %1214 = vst [vmem:[#allocation3 + $0x58] sm:$0xf] %v1206_v9  ;;  %1609 = vmatprep.subr.bf16.mxu0 %v1576_v20  ;;  %v1198_v54 = vpop.permute.xlu1 %1197 }
 0x43a   : > { %v1205_v59 = vsel %vm545_vm6, %v1198_v54, %v1200_v53 }
 0x43b   : > { %v1340_v11 = vpop.permute.xlu0 %1339  ;;  %1213 = vst [vmem:[#allocation3 + $0x50] sm:$0xf] %v1205_v59 }
 0x43c   : > { %v1344_v31 = vsel %vm634_vm10, %v1338_v47, %v1340_v11  ;;  %1610 = vmatpush1.bf16.msra.mxu0 %v1575_v27 }
 0x43d   : > { %v1574_v34 = vpack.c.bf16 %v1344_v31, %v1550_v3 }
 0x43f   : > { %v1239_v35 = vpop.permute.xlu0 %1238  ;;  %1611 = vmatprep.subr.bf16.mxu0 %v1574_v34 }
 0x440   : > { %v1249_v10 = vsel %vm567_vm15, %v1239_v35, %v1241_v16  ;;  %1612 = vmatpush1.bf16.msra.mxu0 %v1573_v18 }
 0x441   : > { %1257 = vst [vmem:[#allocation3 + $0x58] sm:$0xf0] %v1249_v10  ;;  %1613 = vmatprep.subr.bf16.mxu0 %v1572_v13 }
 0x443   : > { %v1192_v42 = vpop.permute.xlu0 %1191 }
 0x444   : > { %v1203_v21 = vsel %vm545_vm6, %v1192_v42, %v2481_v14  ;;  %1614 = vmatpush1.bf16.msra.mxu0 %v1571_v17  ;;  %vm1590_vm6 = vcmask 883712  }
 0x445   : > { %1211 = vst [vmem:[#allocation3] sm:$0xff] %v1203_v21 }
 0x446   : > { %v1588_v14 = vpop.permute.xlu1 %1587 }
 0x447   : > { %v1237_v44 = vpop.permute.xlu0 %1236 }
 0x448   : > { %v1248_v28 = vsel %vm567_vm15, %v1237_v44, %v1239_v35  ;;  %v1544_v60 = vld [vmem:[#allocation3 + $0x58] sm:$0xff] }
 0x449   : > { %1256 = vst [vmem:[#allocation3 + $0x50] sm:$0xf0] %v1248_v28  ;;  %v1570_v45 = vpack.c.bf16 %v1544_v60, %v2490_v19 }
 0x44b   : > { %1615 = vmatprep.subr.bf16.mxu0 %v1570_v45 }
 0x450   : > { %v1543_v46 = vld [vmem:[#allocation3 + $0x50] sm:$0xff] }
 0x451   : > { %v1569_v48 = vpack.c.bf16 %v1543_v46, %v1203_v21 }
 0x453   : > { %1616 = vmatpush1.bf16.msra.mxu0 %v1569_v48 }
 0x456   : > { %1742 = vmatmul.mubr.msk.bf16.vlgmr.msra.gmra.mxu0 %vm1590_vm6, %v1583_v29 }
 0x516   : > { %v1635_v32 = vpop.f32.mrf.mxu0 }
 0x517   : > { %v1636_v8 = vadd.f32 %v1635_v32, %v1588_v14 }
 0x518   : > { %v1637_v23 = vpop.f32.mrf.mxu0 }
 0x519   : > { %v1644_v19 = vrot.slane %v1636_v8, 4  ;;  %v1638_v40 = vadd.f32 %v1637_v23, %v1588_v14 }
 0x51a   : > { %v1639_v15 = vpop.f32.mrf.mxu0 }
 0x51b   : > { %1648 = vst [vmem:[%s2062_s1 + $0x10] sm:$0xf0] %v1644_v19  ;;  %v1645_v12 = vrot.slane %v1638_v40, 4 }
 0x51c   : > { %v1640_v39 = vpop.f32.mrf.mxu0 }
 0x51d   : > { %1649 = vst [vmem:[%s2062_s1 + $0x18] sm:$0xf0] %v1645_v12 }
 0x51e   : > { %1851 = shalt.err (!%p1848_p3)
}
 0x51f   : > { %s1852_s1 = scalar_lea.hbm %s2621_s4, 512  ;;  %s1856_s21 = scalar_lea.hbm %s2683_s13, 1024 }
 0x520   : > { %p1853_p4 = scmp.ne.s32.totalorder %s2621_s4, %s1852_s1  ;;  %p1857_p9 = scmp.lt.s32.totalorder %s2621_s4, %s2683_s13 }
 0x521   : > { %p1858_p10 = scmp.lt.s32.totalorder %s1856_s21, %s1852_s1 }
 0x522   : > { %p1854_p7 = pnand %p1853_p4, %p2020_p5 }
 0x523   : > { %p1859_p11 = por %p1858_p10, %p1857_p9 }
 0x524   : > { %p1855_p8 = pneg %p1854_p7 }
 0x526   : > { %p1860_p12 = pnand %p1859_p11, %p1855_p8 }
 0x528   : > { %1863 = shalt.err (!%p1860_p12)
}
 0x529   : > { %s1911_s29 = smov 256  }
 0x52a   : > { %1750 = dma.vmem_to_hbm [thread:$0]  (%p2020_p5), %s2624_s22, 512, %s2621_s4, %s2629_s5, %s1911_s29, %s1911_s29, %s2720_s30  }
 0x52b PF: > { %p1756_p13 = scmp.ge.s32.totalorder %s1898_s28, 2  ;;  %s1679_s15 = sand.u32 1, %s1886_s25  }
 0x52c   : > { %s1680_s2 = scalar_lea.sflag [#allocation5], %s1679_s15 }
 0x52d   : > { %p1753_p0 = pnand %p1756_p13, %p2024_p6 }
 0x52f   : > { %p1754_p1 = pneg %p1753_p0 }
 0x531   : > { %1881 = dma.done.wait (%p1754_p1), %s1680_s2, 512  }
 0x532   : > { %1883 = vsyncadd (%p1754_p1), %s1680_s2, 4294966784  ;;  %p23_p2 = scmp.ge.s32.totalorder %s2007_s14, 4   ;;  %s2724_s25 = smov %s1890_s26 }
 0x533   : > { %s2725_s26 = smov %s1894_s27  ;;  %s2726_s27 = smov %s2018_s17 }
 0x534   : > { %s2727_s28 = smov %s2007_s14  ;;  %25 = sbr.rel (!%p23_p2) target bundleno = 10 (0xa), region = 107 }
 0x539   :  { %1685 = vsyncpa [#allocation5], 1 }
 0x53a   :  { %1687 = vsyncpa [#allocation5 + $0x1], 1 }

</bundles_post_ra>
